<compile_context>
chip_gen: v7x
topology: tpu7x:2x2x1
jax: 0.10.0
libtpu: 0.0.40
codegen_flags: <defaults>
</compile_context>

<pallas_src>
import functools

import jax
import jax.numpy as jnp
from jax import lax
from jax.experimental import pallas as pl
from jax.experimental.pallas import tpu as pltpu

INPUT_SIZE = 28
HIDDEN = 64
OUT_DIM = 10


def lstm_head_kernel(x_ref, w_ih_ref, w_hh_ref, b_ref, w_out_ref, b_out_ref,
                     o_ref, *, T, Bp):
    """x_ref: (T*Bp, Ip); w_ih: (Ip, 4*Hp); w_hh: (Hp, 4*Hp); b: (1, 4*Hp);
    w_out: (Hp, OUTp); b_out: (1, OUTp); o_ref: (Bp, OUTp). All zero-padded."""
    Hp = w_hh_ref.shape[0]

    # --- One batched matmul for the whole input projection, bias folded in.
    # (T*Bp, Ip) @ (Ip, 4*Hp) -> (T*Bp, 4*Hp), kept as values in vregs/VMEM.
    xg = (
        jnp.dot(x_ref[...], w_ih_ref[...], preferred_element_type=jnp.float32)
        + b_ref[...]
    )

    w_hh = w_hh_ref[...]
    h = jnp.zeros((Bp, Hp), jnp.float32)
    c = jnp.zeros((Bp, Hp), jnp.float32)

    # --- Statically unrolled recurrence (T is a compile-time constant).
    # Per step: one MXU push (h @ W_hh), lane-aligned gate slices, full-vreg
    # elementwise math. Padded lanes (>= H) stay exactly zero in h and c:
    # gates there are 0 -> c_pad = 0.5*0 + 0.5*tanh(0) = 0, h_pad = 0.5*tanh(0)=0,
    # and W_hh rows >= H are zero so nothing leaks back into valid lanes.
    for t in range(T):
        gates = xg[t * Bp:(t + 1) * Bp, :] + jnp.dot(
            h, w_hh, preferred_element_type=jnp.float32)  # (Bp, 4*Hp)
        # PyTorch LSTM gate order: i, f, g, o — each slice is one 128-lane group.
        i_g = jax.nn.sigmoid(gates[:, 0 * Hp:1 * Hp])
        f_g = jax.nn.sigmoid(gates[:, 1 * Hp:2 * Hp])
        g_g = jnp.tanh(gates[:, 2 * Hp:3 * Hp])
        o_g = jax.nn.sigmoid(gates[:, 3 * Hp:4 * Hp])
        c = f_g * c + i_g * g_g
        h = o_g * jnp.tanh(c)

    # --- Head: lane-dense (Bp, 128) output store; valid block sliced in wrapper.
    o_ref[...] = (
        jnp.dot(h, w_out_ref[...], preferred_element_type=jnp.float32)
        + b_out_ref[...]
    )


def rnn_forward(x_btI, w_ih, w_hh, b_ih, b_hh, w_out, b_out):
    """x_btI: (B, T, I) float32 (batch-first, matching PyTorch).
    Weights in PyTorch layout: w_ih (4H, I), w_hh (4H, H), w_out (10, H)."""
    B, T, I = x_btI.shape
    H = w_hh.shape[1]

    # Padded, TPU-native sizes.
    Bp = ((B + 7) // 8) * 8          # sublane group
    Ip = ((I + 127) // 128) * 128    # lane-aligned contraction dim
    Hp = 128                          # per-gate lane-aligned hidden
    OUTp = 128                        # lane-dense output

    f32 = jnp.float32

    # ---- Glue: layout plumbing only (transpose / zero-pad / reshape). ----
    # Input: batch-first -> time-major, pad B and I, flatten to (T*Bp, Ip).
    x_tbi = jnp.transpose(x_btI, (1, 0, 2)).astype(f32)               # (T, B, I)
    x_pad = jnp.zeros((T, Bp, Ip), f32).at[:, :B, :I].set(x_tbi)
    x2d = x_pad.reshape(T * Bp, Ip)

    # Gate-structured weights: transpose to "x @ W" form, pad each gate block
    # to Hp columns (zeros) and contraction dims to Ip/Hp rows (zeros).
    w_ih_g = jnp.transpose(w_ih).astype(f32).reshape(I, 4, H)          # (I,4,H)
    w_ih_p = jnp.zeros((Ip, 4, Hp), f32).at[:I, :, :H].set(w_ih_g)
    w_ih_p = w_ih_p.reshape(Ip, 4 * Hp)                                # (Ip,4Hp)

    w_hh_g = jnp.transpose(w_hh).astype(f32).reshape(H, 4, H)          # (H,4,H)
    w_hh_p = jnp.zeros((Hp, 4, Hp), f32).at[:H, :, :H].set(w_hh_g)
    w_hh_p = w_hh_p.reshape(Hp, 4 * Hp)                                # (Hp,4Hp)

    b_g = (b_ih + b_hh).astype(f32).reshape(4, H)
    b_p = jnp.zeros((4, Hp), f32).at[:, :H].set(b_g).reshape(1, 4 * Hp)

    w_out_p = jnp.zeros((Hp, OUTp), f32).at[:H, :OUT_DIM].set(
        jnp.transpose(w_out).astype(f32))                              # (Hp,128)
    b_out_p = jnp.zeros((1, OUTp), f32).at[0, :OUT_DIM].set(
        b_out.astype(f32))                                             # (1,128)

    vmem = pl.BlockSpec(memory_space=pltpu.MemorySpace.VMEM)
    out_pad = pl.pallas_call(
        functools.partial(lstm_head_kernel, T=T, Bp=Bp),
        out_shape=jax.ShapeDtypeStruct((Bp, OUTp), f32),
        in_specs=[vmem] * 6,
        out_specs=vmem,
        compiler_params=pltpu.CompilerParams(
            vmem_limit_bytes=32 * 1024 * 1024),
    )(x2d, w_ih_p, w_hh_p, b_p, w_out_p, b_out_p)

    return out_pad[:B, :OUT_DIM]


def _reference_forward(x_btI, w_ih, w_hh, b_ih, b_hh, w_out, b_out):
    """Pure-JAX reference mirroring torch.nn.LSTM + Linear semantics."""
    B, T, I = x_btI.shape
    H = w_hh.shape[1]
    h = jnp.zeros((B, H), jnp.float32)
    c = jnp.zeros((B, H), jnp.float32)

    def step(carry, x_t):
        h, c = carry
        gates = x_t @ w_ih.T + b_ih + h @ w_hh.T + b_hh
        i_g = jax.nn.sigmoid(gates[:, 0 * H:1 * H])
        f_g = jax.nn.sigmoid(gates[:, 1 * H:2 * H])
        g_g = jnp.tanh(gates[:, 2 * H:3 * H])
        o_g = jax.nn.sigmoid(gates[:, 3 * H:4 * H])
        c_new = f_g * c + i_g * g_g
        h_new = o_g * jnp.tanh(c_new)
        return (h_new, c_new), None

    (h_last, _), _ = lax.scan(step, (h, c), jnp.transpose(x_btI, (1, 0, 2)))
    return h_last @ w_out.T + b_out


if __name__ == "__main__":
    key = jax.random.PRNGKey(0)
    kx, k1, k2, k3, k4, k5, k6 = jax.random.split(key, 7)

    B, T = 2, 8
    # Deterministic parameter init (PyTorch-style uniform(-1/sqrt(H), 1/sqrt(H))).
    bound = 1.0 / jnp.sqrt(jnp.float32(HIDDEN))
    w_ih = jax.random.uniform(k1, (4 * HIDDEN, INPUT_SIZE), jnp.float32, -bound, bound)
    w_hh = jax.random.uniform(k2, (4 * HIDDEN, HIDDEN), jnp.float32, -bound, bound)
    b_ih = jax.random.uniform(k3, (4 * HIDDEN,), jnp.float32, -bound, bound)
    b_hh = jax.random.uniform(k4, (4 * HIDDEN,), jnp.float32, -bound, bound)
    w_out = jax.random.uniform(k5, (OUT_DIM, HIDDEN), jnp.float32, -bound, bound)
    b_out = jax.random.uniform(k6, (OUT_DIM,), jnp.float32, -bound, bound)

    x = jax.random.normal(kx, (B, T, INPUT_SIZE), jnp.float32)

    out = rnn_forward(x, w_ih, w_hh, b_ih, b_hh, w_out, b_out)
    out = jax.block_until_ready(out)

    ref = _reference_forward(x, w_ih, w_hh, b_ih, b_hh, w_out, b_out)
    assert out.shape == (B, OUT_DIM)
    assert jnp.allclose(out, ref, atol=1e-4, rtol=1e-4)

    print("KERNEL_OK")
</pallas_src>

<mosaic_0001>
module attributes {stable_mosaic.version = 11 : i64} {
  func.func @lstm_head_kernel(%arg0: memref<64x128xf32, #tpu.memory_space<vmem>>, %arg1: memref<128x512xf32, #tpu.memory_space<vmem>>, %arg2: memref<128x512xf32, #tpu.memory_space<vmem>>, %arg3: memref<1x512xf32, #tpu.memory_space<vmem>>, %arg4: memref<128x128xf32, #tpu.memory_space<vmem>>, %arg5: memref<1x128xf32, #tpu.memory_space<vmem>>, %arg6: memref<8x128xf32, #tpu.memory_space<vmem>>) attributes {dimension_semantics = [], scalar_prefetch = 0 : i64, scratch_operands = 0 : i64, tpu.core_type = #tpu.core_type<tc>} {
    %c0 = arith.constant 0 : index
    %c0_0 = arith.constant 0 : index
    %0 = vector.load %arg0[%c0, %c0_0] : memref<64x128xf32, #tpu.memory_space<vmem>>, vector<64x128xf32>
    %c0_1 = arith.constant 0 : index
    %c0_2 = arith.constant 0 : index
    %1 = vector.load %arg1[%c0_1, %c0_2] : memref<128x512xf32, #tpu.memory_space<vmem>>, vector<128x512xf32>
    %cst = arith.constant dense<0.000000e+00> : vector<64x512xf32>
    %2 = tpu.matmul %0, %1, %cst {dimension_numbers = #tpu.dot_dimension_numbers<[1], [0], [0], [1], [0, 0, 1, 1], [], []>} : vector<64x128xf32>, vector<128x512xf32>, vector<64x512xf32> -> vector<64x512xf32>
    %c0_3 = arith.constant 0 : index
    %c0_4 = arith.constant 0 : index
    %3 = vector.load %arg3[%c0_3, %c0_4] : memref<1x512xf32, #tpu.memory_space<vmem>>, vector<1x512xf32>
    %4 = vector.broadcast %3 : vector<1x512xf32> to vector<64x512xf32>
    %5 = arith.addf %2, %4 : vector<64x512xf32>
    %c0_5 = arith.constant 0 : index
    %c0_6 = arith.constant 0 : index
    %6 = vector.load %arg2[%c0_5, %c0_6] : memref<128x512xf32, #tpu.memory_space<vmem>>, vector<128x512xf32>
    %cst_7 = arith.constant 0.000000e+00 : f32
    %7 = vector.broadcast %cst_7 : f32 to vector<8x128xf32>
    %cst_8 = arith.constant 0.000000e+00 : f32
    %8 = vector.broadcast %cst_8 : f32 to vector<8x128xf32>
    %9 = vector.extract_strided_slice %5 {offsets = [0, 0], sizes = [8, 512], strides = [1, 1]} : vector<64x512xf32> to vector<8x512xf32>
    %cst_9 = arith.constant dense<0.000000e+00> : vector<8x512xf32>
    %10 = tpu.matmul %7, %6, %cst_9 {dimension_numbers = #tpu.dot_dimension_numbers<[1], [0], [0], [1], [0, 0, 1, 1], [], []>} : vector<8x128xf32>, vector<128x512xf32>, vector<8x512xf32> -> vector<8x512xf32>
    %11 = arith.addf %9, %10 : vector<8x512xf32>
    %12 = vector.extract_strided_slice %11 {offsets = [0, 0], sizes = [8, 128], strides = [1, 1]} : vector<8x512xf32> to vector<8x128xf32>
    %13 = arith.negf %12 : vector<8x128xf32>
    %14 = math.exp %13 : vector<8x128xf32>
    %cst_10 = arith.constant 1.000000e+00 : f32
    %15 = vector.broadcast %cst_10 : f32 to vector<8x128xf32>
    %16 = arith.addf %15, %14 : vector<8x128xf32>
    %17 = arith.divf %15, %16 : vector<8x128xf32>
    %18 = vector.extract_strided_slice %11 {offsets = [0, 128], sizes = [8, 128], strides = [1, 1]} : vector<8x512xf32> to vector<8x128xf32>
    %19 = arith.negf %18 : vector<8x128xf32>
    %20 = math.exp %19 : vector<8x128xf32>
    %cst_11 = arith.constant 1.000000e+00 : f32
    %21 = vector.broadcast %cst_11 : f32 to vector<8x128xf32>
    %22 = arith.addf %21, %20 : vector<8x128xf32>
    %23 = arith.divf %21, %22 : vector<8x128xf32>
    %24 = vector.extract_strided_slice %11 {offsets = [0, 256], sizes = [8, 128], strides = [1, 1]} : vector<8x512xf32> to vector<8x128xf32>
    %25 = math.tanh %24 : vector<8x128xf32>
    %26 = vector.extract_strided_slice %11 {offsets = [0, 384], sizes = [8, 128], strides = [1, 1]} : vector<8x512xf32> to vector<8x128xf32>
    %27 = arith.negf %26 : vector<8x128xf32>
    %28 = math.exp %27 : vector<8x128xf32>
    %cst_12 = arith.constant 1.000000e+00 : f32
    %29 = vector.broadcast %cst_12 : f32 to vector<8x128xf32>
    %30 = arith.addf %29, %28 : vector<8x128xf32>
    %31 = arith.divf %29, %30 : vector<8x128xf32>
    %32 = arith.mulf %23, %8 : vector<8x128xf32>
    %33 = arith.mulf %17, %25 : vector<8x128xf32>
    %34 = arith.addf %32, %33 : vector<8x128xf32>
    %35 = math.tanh %34 : vector<8x128xf32>
    %36 = arith.mulf %31, %35 : vector<8x128xf32>
    %37 = vector.extract_strided_slice %5 {offsets = [8, 0], sizes = [8, 512], strides = [1, 1]} : vector<64x512xf32> to vector<8x512xf32>
    %cst_13 = arith.constant dense<0.000000e+00> : vector<8x512xf32>
    %38 = tpu.matmul %36, %6, %cst_13 {dimension_numbers = #tpu.dot_dimension_numbers<[1], [0], [0], [1], [0, 0, 1, 1], [], []>} : vector<8x128xf32>, vector<128x512xf32>, vector<8x512xf32> -> vector<8x512xf32>
    %39 = arith.addf %37, %38 : vector<8x512xf32>
    %40 = vector.extract_strided_slice %39 {offsets = [0, 0], sizes = [8, 128], strides = [1, 1]} : vector<8x512xf32> to vector<8x128xf32>
    %41 = arith.negf %40 : vector<8x128xf32>
    %42 = math.exp %41 : vector<8x128xf32>
    %cst_14 = arith.constant 1.000000e+00 : f32
    %43 = vector.broadcast %cst_14 : f32 to vector<8x128xf32>
    %44 = arith.addf %43, %42 : vector<8x128xf32>
    %45 = arith.divf %43, %44 : vector<8x128xf32>
    %46 = vector.extract_strided_slice %39 {offsets = [0, 128], sizes = [8, 128], strides = [1, 1]} : vector<8x512xf32> to vector<8x128xf32>
    %47 = arith.negf %46 : vector<8x128xf32>
    %48 = math.exp %47 : vector<8x128xf32>
    %cst_15 = arith.constant 1.000000e+00 : f32
    %49 = vector.broadcast %cst_15 : f32 to vector<8x128xf32>
    %50 = arith.addf %49, %48 : vector<8x128xf32>
    %51 = arith.divf %49, %50 : vector<8x128xf32>
    %52 = vector.extract_strided_slice %39 {offsets = [0, 256], sizes = [8, 128], strides = [1, 1]} : vector<8x512xf32> to vector<8x128xf32>
    %53 = math.tanh %52 : vector<8x128xf32>
    %54 = vector.extract_strided_slice %39 {offsets = [0, 384], sizes = [8, 128], strides = [1, 1]} : vector<8x512xf32> to vector<8x128xf32>
    %55 = arith.negf %54 : vector<8x128xf32>
    %56 = math.exp %55 : vector<8x128xf32>
    %cst_16 = arith.constant 1.000000e+00 : f32
    %57 = vector.broadcast %cst_16 : f32 to vector<8x128xf32>
    %58 = arith.addf %57, %56 : vector<8x128xf32>
    %59 = arith.divf %57, %58 : vector<8x128xf32>
    %60 = arith.mulf %51, %34 : vector<8x128xf32>
    %61 = arith.mulf %45, %53 : vector<8x128xf32>
    %62 = arith.addf %60, %61 : vector<8x128xf32>
    %63 = math.tanh %62 : vector<8x128xf32>
    %64 = arith.mulf %59, %63 : vector<8x128xf32>
    %65 = vector.extract_strided_slice %5 {offsets = [16, 0], sizes = [8, 512], strides = [1, 1]} : vector<64x512xf32> to vector<8x512xf32>
    %cst_17 = arith.constant dense<0.000000e+00> : vector<8x512xf32>
    %66 = tpu.matmul %64, %6, %cst_17 {dimension_numbers = #tpu.dot_dimension_numbers<[1], [0], [0], [1], [0, 0, 1, 1], [], []>} : vector<8x128xf32>, vector<128x512xf32>, vector<8x512xf32> -> vector<8x512xf32>
    %67 = arith.addf %65, %66 : vector<8x512xf32>
    %68 = vector.extract_strided_slice %67 {offsets = [0, 0], sizes = [8, 128], strides = [1, 1]} : vector<8x512xf32> to vector<8x128xf32>
    %69 = arith.negf %68 : vector<8x128xf32>
    %70 = math.exp %69 : vector<8x128xf32>
    %cst_18 = arith.constant 1.000000e+00 : f32
    %71 = vector.broadcast %cst_18 : f32 to vector<8x128xf32>
    %72 = arith.addf %71, %70 : vector<8x128xf32>
    %73 = arith.divf %71, %72 : vector<8x128xf32>
    %74 = vector.extract_strided_slice %67 {offsets = [0, 128], sizes = [8, 128], strides = [1, 1]} : vector<8x512xf32> to vector<8x128xf32>
    %75 = arith.negf %74 : vector<8x128xf32>
    %76 = math.exp %75 : vector<8x128xf32>
    %cst_19 = arith.constant 1.000000e+00 : f32
    %77 = vector.broadcast %cst_19 : f32 to vector<8x128xf32>
    %78 = arith.addf %77, %76 : vector<8x128xf32>
    %79 = arith.divf %77, %78 : vector<8x128xf32>
    %80 = vector.extract_strided_slice %67 {offsets = [0, 256], sizes = [8, 128], strides = [1, 1]} : vector<8x512xf32> to vector<8x128xf32>
    %81 = math.tanh %80 : vector<8x128xf32>
    %82 = vector.extract_strided_slice %67 {offsets = [0, 384], sizes = [8, 128], strides = [1, 1]} : vector<8x512xf32> to vector<8x128xf32>
    %83 = arith.negf %82 : vector<8x128xf32>
    %84 = math.exp %83 : vector<8x128xf32>
    %cst_20 = arith.constant 1.000000e+00 : f32
    %85 = vector.broadcast %cst_20 : f32 to vector<8x128xf32>
    %86 = arith.addf %85, %84 : vector<8x128xf32>
    %87 = arith.divf %85, %86 : vector<8x128xf32>
    %88 = arith.mulf %79, %62 : vector<8x128xf32>
    %89 = arith.mulf %73, %81 : vector<8x128xf32>
    %90 = arith.addf %88, %89 : vector<8x128xf32>
    %91 = math.tanh %90 : vector<8x128xf32>
    %92 = arith.mulf %87, %91 : vector<8x128xf32>
    %93 = vector.extract_strided_slice %5 {offsets = [24, 0], sizes = [8, 512], strides = [1, 1]} : vector<64x512xf32> to vector<8x512xf32>
    %cst_21 = arith.constant dense<0.000000e+00> : vector<8x512xf32>
    %94 = tpu.matmul %92, %6, %cst_21 {dimension_numbers = #tpu.dot_dimension_numbers<[1], [0], [0], [1], [0, 0, 1, 1], [], []>} : vector<8x128xf32>, vector<128x512xf32>, vector<8x512xf32> -> vector<8x512xf32>
    %95 = arith.addf %93, %94 : vector<8x512xf32>
    %96 = vector.extract_strided_slice %95 {offsets = [0, 0], sizes = [8, 128], strides = [1, 1]} : vector<8x512xf32> to vector<8x128xf32>
    %97 = arith.negf %96 : vector<8x128xf32>
    %98 = math.exp %97 : vector<8x128xf32>
    %cst_22 = arith.constant 1.000000e+00 : f32
    %99 = vector.broadcast %cst_22 : f32 to vector<8x128xf32>
    %100 = arith.addf %99, %98 : vector<8x128xf32>
    %101 = arith.divf %99, %100 : vector<8x128xf32>
    %102 = vector.extract_strided_slice %95 {offsets = [0, 128], sizes = [8, 128], strides = [1, 1]} : vector<8x512xf32> to vector<8x128xf32>
    %103 = arith.negf %102 : vector<8x128xf32>
    %104 = math.exp %103 : vector<8x128xf32>
    %cst_23 = arith.constant 1.000000e+00 : f32
    %105 = vector.broadcast %cst_23 : f32 to vector<8x128xf32>
    %106 = arith.addf %105, %104 : vector<8x128xf32>
    %107 = arith.divf %105, %106 : vector<8x128xf32>
    %108 = vector.extract_strided_slice %95 {offsets = [0, 256], sizes = [8, 128], strides = [1, 1]} : vector<8x512xf32> to vector<8x128xf32>
    %109 = math.tanh %108 : vector<8x128xf32>
    %110 = vector.extract_strided_slice %95 {offsets = [0, 384], sizes = [8, 128], strides = [1, 1]} : vector<8x512xf32> to vector<8x128xf32>
    %111 = arith.negf %110 : vector<8x128xf32>
    %112 = math.exp %111 : vector<8x128xf32>
    %cst_24 = arith.constant 1.000000e+00 : f32
    %113 = vector.broadcast %cst_24 : f32 to vector<8x128xf32>
    %114 = arith.addf %113, %112 : vector<8x128xf32>
    %115 = arith.divf %113, %114 : vector<8x128xf32>
    %116 = arith.mulf %107, %90 : vector<8x128xf32>
    %117 = arith.mulf %101, %109 : vector<8x128xf32>
    %118 = arith.addf %116, %117 : vector<8x128xf32>
    %119 = math.tanh %118 : vector<8x128xf32>
    %120 = arith.mulf %115, %119 : vector<8x128xf32>
    %121 = vector.extract_strided_slice %5 {offsets = [32, 0], sizes = [8, 512], strides = [1, 1]} : vector<64x512xf32> to vector<8x512xf32>
    %cst_25 = arith.constant dense<0.000000e+00> : vector<8x512xf32>
    %122 = tpu.matmul %120, %6, %cst_25 {dimension_numbers = #tpu.dot_dimension_numbers<[1], [0], [0], [1], [0, 0, 1, 1], [], []>} : vector<8x128xf32>, vector<128x512xf32>, vector<8x512xf32> -> vector<8x512xf32>
    %123 = arith.addf %121, %122 : vector<8x512xf32>
    %124 = vector.extract_strided_slice %123 {offsets = [0, 0], sizes = [8, 128], strides = [1, 1]} : vector<8x512xf32> to vector<8x128xf32>
    %125 = arith.negf %124 : vector<8x128xf32>
    %126 = math.exp %125 : vector<8x128xf32>
    %cst_26 = arith.constant 1.000000e+00 : f32
    %127 = vector.broadcast %cst_26 : f32 to vector<8x128xf32>
    %128 = arith.addf %127, %126 : vector<8x128xf32>
    %129 = arith.divf %127, %128 : vector<8x128xf32>
    %130 = vector.extract_strided_slice %123 {offsets = [0, 128], sizes = [8, 128], strides = [1, 1]} : vector<8x512xf32> to vector<8x128xf32>
    %131 = arith.negf %130 : vector<8x128xf32>
    %132 = math.exp %131 : vector<8x128xf32>
    %cst_27 = arith.constant 1.000000e+00 : f32
    %133 = vector.broadcast %cst_27 : f32 to vector<8x128xf32>
    %134 = arith.addf %133, %132 : vector<8x128xf32>
    %135 = arith.divf %133, %134 : vector<8x128xf32>
    %136 = vector.extract_strided_slice %123 {offsets = [0, 256], sizes = [8, 128], strides = [1, 1]} : vector<8x512xf32> to vector<8x128xf32>
    %137 = math.tanh %136 : vector<8x128xf32>
    %138 = vector.extract_strided_slice %123 {offsets = [0, 384], sizes = [8, 128], strides = [1, 1]} : vector<8x512xf32> to vector<8x128xf32>
    %139 = arith.negf %138 : vector<8x128xf32>
    %140 = math.exp %139 : vector<8x128xf32>
    %cst_28 = arith.constant 1.000000e+00 : f32
    %141 = vector.broadcast %cst_28 : f32 to vector<8x128xf32>
    %142 = arith.addf %141, %140 : vector<8x128xf32>
    %143 = arith.divf %141, %142 : vector<8x128xf32>
    %144 = arith.mulf %135, %118 : vector<8x128xf32>
    %145 = arith.mulf %129, %137 : vector<8x128xf32>
    %146 = arith.addf %144, %145 : vector<8x128xf32>
    %147 = math.tanh %146 : vector<8x128xf32>
    %148 = arith.mulf %143, %147 : vector<8x128xf32>
    %149 = vector.extract_strided_slice %5 {offsets = [40, 0], sizes = [8, 512], strides = [1, 1]} : vector<64x512xf32> to vector<8x512xf32>
    %cst_29 = arith.constant dense<0.000000e+00> : vector<8x512xf32>
    %150 = tpu.matmul %148, %6, %cst_29 {dimension_numbers = #tpu.dot_dimension_numbers<[1], [0], [0], [1], [0, 0, 1, 1], [], []>} : vector<8x128xf32>, vector<128x512xf32>, vector<8x512xf32> -> vector<8x512xf32>
    %151 = arith.addf %149, %150 : vector<8x512xf32>
    %152 = vector.extract_strided_slice %151 {offsets = [0, 0], sizes = [8, 128], strides = [1, 1]} : vector<8x512xf32> to vector<8x128xf32>
    %153 = arith.negf %152 : vector<8x128xf32>
    %154 = math.exp %153 : vector<8x128xf32>
    %cst_30 = arith.constant 1.000000e+00 : f32
    %155 = vector.broadcast %cst_30 : f32 to vector<8x128xf32>
    %156 = arith.addf %155, %154 : vector<8x128xf32>
    %157 = arith.divf %155, %156 : vector<8x128xf32>
    %158 = vector.extract_strided_slice %151 {offsets = [0, 128], sizes = [8, 128], strides = [1, 1]} : vector<8x512xf32> to vector<8x128xf32>
    %159 = arith.negf %158 : vector<8x128xf32>
    %160 = math.exp %159 : vector<8x128xf32>
    %cst_31 = arith.constant 1.000000e+00 : f32
    %161 = vector.broadcast %cst_31 : f32 to vector<8x128xf32>
    %162 = arith.addf %161, %160 : vector<8x128xf32>
    %163 = arith.divf %161, %162 : vector<8x128xf32>
    %164 = vector.extract_strided_slice %151 {offsets = [0, 256], sizes = [8, 128], strides = [1, 1]} : vector<8x512xf32> to vector<8x128xf32>
    %165 = math.tanh %164 : vector<8x128xf32>
    %166 = vector.extract_strided_slice %151 {offsets = [0, 384], sizes = [8, 128], strides = [1, 1]} : vector<8x512xf32> to vector<8x128xf32>
    %167 = arith.negf %166 : vector<8x128xf32>
    %168 = math.exp %167 : vector<8x128xf32>
    %cst_32 = arith.constant 1.000000e+00 : f32
    %169 = vector.broadcast %cst_32 : f32 to vector<8x128xf32>
    %170 = arith.addf %169, %168 : vector<8x128xf32>
    %171 = arith.divf %169, %170 : vector<8x128xf32>
    %172 = arith.mulf %163, %146 : vector<8x128xf32>
    %173 = arith.mulf %157, %165 : vector<8x128xf32>
    %174 = arith.addf %172, %173 : vector<8x128xf32>
    %175 = math.tanh %174 : vector<8x128xf32>
    %176 = arith.mulf %171, %175 : vector<8x128xf32>
    %177 = vector.extract_strided_slice %5 {offsets = [48, 0], sizes = [8, 512], strides = [1, 1]} : vector<64x512xf32> to vector<8x512xf32>
    %cst_33 = arith.constant dense<0.000000e+00> : vector<8x512xf32>
    %178 = tpu.matmul %176, %6, %cst_33 {dimension_numbers = #tpu.dot_dimension_numbers<[1], [0], [0], [1], [0, 0, 1, 1], [], []>} : vector<8x128xf32>, vector<128x512xf32>, vector<8x512xf32> -> vector<8x512xf32>
    %179 = arith.addf %177, %178 : vector<8x512xf32>
    %180 = vector.extract_strided_slice %179 {offsets = [0, 0], sizes = [8, 128], strides = [1, 1]} : vector<8x512xf32> to vector<8x128xf32>
    %181 = arith.negf %180 : vector<8x128xf32>
    %182 = math.exp %181 : vector<8x128xf32>
    %cst_34 = arith.constant 1.000000e+00 : f32
    %183 = vector.broadcast %cst_34 : f32 to vector<8x128xf32>
    %184 = arith.addf %183, %182 : vector<8x128xf32>
    %185 = arith.divf %183, %184 : vector<8x128xf32>
    %186 = vector.extract_strided_slice %179 {offsets = [0, 128], sizes = [8, 128], strides = [1, 1]} : vector<8x512xf32> to vector<8x128xf32>
    %187 = arith.negf %186 : vector<8x128xf32>
    %188 = math.exp %187 : vector<8x128xf32>
    %cst_35 = arith.constant 1.000000e+00 : f32
    %189 = vector.broadcast %cst_35 : f32 to vector<8x128xf32>
    %190 = arith.addf %189, %188 : vector<8x128xf32>
    %191 = arith.divf %189, %190 : vector<8x128xf32>
    %192 = vector.extract_strided_slice %179 {offsets = [0, 256], sizes = [8, 128], strides = [1, 1]} : vector<8x512xf32> to vector<8x128xf32>
    %193 = math.tanh %192 : vector<8x128xf32>
    %194 = vector.extract_strided_slice %179 {offsets = [0, 384], sizes = [8, 128], strides = [1, 1]} : vector<8x512xf32> to vector<8x128xf32>
    %195 = arith.negf %194 : vector<8x128xf32>
    %196 = math.exp %195 : vector<8x128xf32>
    %cst_36 = arith.constant 1.000000e+00 : f32
    %197 = vector.broadcast %cst_36 : f32 to vector<8x128xf32>
    %198 = arith.addf %197, %196 : vector<8x128xf32>
    %199 = arith.divf %197, %198 : vector<8x128xf32>
    %200 = arith.mulf %191, %174 : vector<8x128xf32>
    %201 = arith.mulf %185, %193 : vector<8x128xf32>
    %202 = arith.addf %200, %201 : vector<8x128xf32>
    %203 = math.tanh %202 : vector<8x128xf32>
    %204 = arith.mulf %199, %203 : vector<8x128xf32>
    %205 = vector.extract_strided_slice %5 {offsets = [56, 0], sizes = [8, 512], strides = [1, 1]} : vector<64x512xf32> to vector<8x512xf32>
    %cst_37 = arith.constant dense<0.000000e+00> : vector<8x512xf32>
    %206 = tpu.matmul %204, %6, %cst_37 {dimension_numbers = #tpu.dot_dimension_numbers<[1], [0], [0], [1], [0, 0, 1, 1], [], []>} : vector<8x128xf32>, vector<128x512xf32>, vector<8x512xf32> -> vector<8x512xf32>
    %207 = arith.addf %205, %206 : vector<8x512xf32>
    %208 = vector.extract_strided_slice %207 {offsets = [0, 0], sizes = [8, 128], strides = [1, 1]} : vector<8x512xf32> to vector<8x128xf32>
    %209 = arith.negf %208 : vector<8x128xf32>
    %210 = math.exp %209 : vector<8x128xf32>
    %cst_38 = arith.constant 1.000000e+00 : f32
    %211 = vector.broadcast %cst_38 : f32 to vector<8x128xf32>
    %212 = arith.addf %211, %210 : vector<8x128xf32>
    %213 = arith.divf %211, %212 : vector<8x128xf32>
    %214 = vector.extract_strided_slice %207 {offsets = [0, 128], sizes = [8, 128], strides = [1, 1]} : vector<8x512xf32> to vector<8x128xf32>
    %215 = arith.negf %214 : vector<8x128xf32>
    %216 = math.exp %215 : vector<8x128xf32>
    %cst_39 = arith.constant 1.000000e+00 : f32
    %217 = vector.broadcast %cst_39 : f32 to vector<8x128xf32>
    %218 = arith.addf %217, %216 : vector<8x128xf32>
    %219 = arith.divf %217, %218 : vector<8x128xf32>
    %220 = vector.extract_strided_slice %207 {offsets = [0, 256], sizes = [8, 128], strides = [1, 1]} : vector<8x512xf32> to vector<8x128xf32>
    %221 = math.tanh %220 : vector<8x128xf32>
    %222 = vector.extract_strided_slice %207 {offsets = [0, 384], sizes = [8, 128], strides = [1, 1]} : vector<8x512xf32> to vector<8x128xf32>
    %223 = arith.negf %222 : vector<8x128xf32>
    %224 = math.exp %223 : vector<8x128xf32>
    %cst_40 = arith.constant 1.000000e+00 : f32
    %225 = vector.broadcast %cst_40 : f32 to vector<8x128xf32>
    %226 = arith.addf %225, %224 : vector<8x128xf32>
    %227 = arith.divf %225, %226 : vector<8x128xf32>
    %228 = arith.mulf %219, %202 : vector<8x128xf32>
    %229 = arith.mulf %213, %221 : vector<8x128xf32>
    %230 = arith.addf %228, %229 : vector<8x128xf32>
    %231 = math.tanh %230 : vector<8x128xf32>
    %232 = arith.mulf %227, %231 : vector<8x128xf32>
    %c0_41 = arith.constant 0 : index
    %c0_42 = arith.constant 0 : index
    %233 = vector.load %arg4[%c0_41, %c0_42] : memref<128x128xf32, #tpu.memory_space<vmem>>, vector<128x128xf32>
    %cst_43 = arith.constant dense<0.000000e+00> : vector<8x128xf32>
    %234 = tpu.matmul %232, %233, %cst_43 {dimension_numbers = #tpu.dot_dimension_numbers<[1], [0], [0], [1], [0, 0, 1, 1], [], []>} : vector<8x128xf32>, vector<128x128xf32>, vector<8x128xf32> -> vector<8x128xf32>
    %c0_44 = arith.constant 0 : index
    %c0_45 = arith.constant 0 : index
    %235 = vector.load %arg5[%c0_44, %c0_45] : memref<1x128xf32, #tpu.memory_space<vmem>>, vector<1x128xf32>
    %236 = vector.broadcast %235 : vector<1x128xf32> to vector<8x128xf32>
    %237 = arith.addf %234, %236 : vector<8x128xf32>
    %c0_46 = arith.constant 0 : index
    %c0_47 = arith.constant 0 : index
    %238 = vector.load %arg6[%c0_46, %c0_47] : memref<8x128xf32, #tpu.memory_space<vmem>>, vector<8x128xf32>
    tpu.vector_store %arg6[%c0_46, %c0_47], %237 {strides = array<i32>} : memref<8x128xf32, #tpu.memory_space<vmem>>, vector<8x128xf32>,
    return
  }
}

</mosaic_0001>

<bundles_post_ra>
// kernel: tpu_custom_call.1
= control target key start
LH: loop header
LB: loop body
LE: loop exit
PB: predicated region body
PF: predicated region fallthrough
CT: control target
= control target key end

     0   :  { %11 = vsyncpa [#allocation3], 0  ;;  %s3488_s0 = inlined_call_operand.hbm [shape: f32[64,128], index: 0, kind: input, shape index: {}]   ;;  %s3489_s1 = inlined_call_operand.hbm [shape: f32[128,512], index: 1, kind: input, shape index: {}]   ;;  %s3490_s2 = inlined_call_operand.hbm [shape: f32[128,512], index: 2, kind: input, shape index: {}]   ;;  %s3491_s3 = inlined_call_operand.vmem [shape: f32[1,512], index: 3, kind: input, shape index: {}]   ;;  %s3492_s4 = inlined_call_operand.hbm [shape: f32[128,128], index: 4, kind: input, shape index: {}]   ;;  %s3493_s5 = inlined_call_operand.vmem [shape: f32[1,128], index: 5, kind: input, shape index: {}]   ;;  %s3494_s6 = inlined_call_operand.hbm [shape: f32[8,128], index: 6, kind: output, shape index: {}]  }
   0x1   :  { %12 = vsyncpa [#allocation6], 0 }
   0x2   :  { %13 = vsyncpa [#allocation9], 0 }
   0x3   :  { %14 = vsyncpa [#allocation4], 0  ;;  %s2933_s21 = smov [#allocation5]   ;;  %s2815_s25 = scalar_lea.hbm %s3489_s1, 8192 }
   0x4   :  { %s32_s22 = sshll.u32 %s2933_s21, 4  ;;  %p2816_p0 = scmp.ne.s32.totalorder %s3489_s1, %s2815_s25  ;;  %s33_s22 = int_to_ptr.vmem [resolvable:$true] %s32_s22 }
   0x5   :  { %p2819_p1 = scmp.lt.u32.totalorder %s2815_s25, %s3489_s1 }
   0x7   :  { %p2821_p2 = pnand %p2819_p1, %p2816_p0 }
   0x9   :  { %2824 = shalt.err (!%p2821_p2)
}
   0xa   :  { %s2825_s30 = scalar_lea.vmem %s33_s22, 8192  ;;  %p2830_p4 = scmp.lt.s32.totalorder %s33_s22, %s33_s22 }
   0xb   :  { %p2826_p3 = scmp.ne.s32.totalorder %s33_s22, %s2825_s30  ;;  %p2831_p5 = scmp.lt.s32.totalorder %s2825_s30, %s2825_s30 }
   0xd   :  { %p2832_p6 = por %p2831_p5, %p2830_p4 }
   0xf   :  { %p2833_p7 = pnand %p2832_p6, %p2826_p3 }
  0x11   :  { %2836 = shalt.err (!%p2833_p7)
}
  0x12   :  { %s2934_s7 = smov 512   ;;  %s2935_s8 = smov 32  }
  0x13   :  { %38 = dma.hbm_to_vmem [thread:$0]  %s3489_s1, 8192, %s33_s22, [#allocation6], %s2934_s7, %s2934_s7, %s2935_s8  }
  0x14   :  { %s2936_s11 = smov [#allocation2]   ;;  %s2837_s15 = scalar_lea.hbm %s3488_s0, 1024 }
  0x15   :  { %s20_s12 = sshll.u32 %s2936_s11, 4  ;;  %p2838_p8 = scmp.ne.s32.totalorder %s3488_s0, %s2837_s15  ;;  %s21_s12 = int_to_ptr.vmem [resolvable:$true] %s20_s12 }
  0x16   :  { %p2841_p9 = scmp.lt.u32.totalorder %s2837_s15, %s3488_s0 }
  0x18   :  { %p2843_p10 = pnand %p2841_p9, %p2838_p8 }
  0x1a   :  { %2846 = shalt.err (!%p2843_p10)
}
  0x1b   :  { %s2847_s20 = scalar_lea.vmem %s21_s12, 1024  ;;  %p2852_p12 = scmp.lt.s32.totalorder %s21_s12, %s21_s12 }
  0x1c   :  { %p2848_p11 = scmp.ne.s32.totalorder %s21_s12, %s2847_s20  ;;  %p2853_p13 = scmp.lt.s32.totalorder %s2847_s20, %s2847_s20 }
  0x1e   :  { %p2854_p0 = por %p2853_p13, %p2852_p12 }
  0x20   :  { %p2855_p1 = pnand %p2854_p0, %p2848_p11 }
  0x22   :  { %2858 = shalt.err (!%p2855_p1)
}
  0x23   :  { %s2937_s1 = smov 128   ;;  %s2938_s21 = smov 8  }
  0x24   :  { %26 = dma.hbm_to_vmem [thread:$0]  %s3488_s0, 1024, %s21_s12, [#allocation3], %s2937_s1, %s2937_s1, %s2938_s21  }
  0x25   :  { %s2939_s24 = smov [#allocation7]   ;;  %s2940_s26 = smov [#allocation8]  }
  0x26   :  { %s44_s25 = sshll.u32 %s2939_s24, 4  ;;  %s58_s27 = sshll.u32 %s2940_s26, 4  ;;  %s45_s25 = int_to_ptr.vmem [resolvable:$true] %s44_s25  ;;  %s3010_s27 = int_to_ptr.vmem [resolvable:$true] %s58_s27 }
  0x27   :  { %s2859_s30 = scalar_lea.hbm %s3490_s2, 8192 }
  0x28   :  { %p2860_p2 = scmp.ne.s32.totalorder %s3490_s2, %s2859_s30  ;;  %p2863_p3 = scmp.lt.u32.totalorder %s2859_s30, %s3490_s2 }
  0x2a   :  { %p2865_p4 = pnand %p2863_p3, %p2860_p2 }
  0x2c   :  { %2868 = shalt.err (!%p2865_p4)
}
  0x2d   :  { %s2869_s0 = scalar_lea.vmem %s45_s25, 8192  ;;  %p2874_p6 = scmp.lt.s32.totalorder %s45_s25, %s45_s25 }
  0x2e   :  { %p2870_p5 = scmp.ne.s32.totalorder %s45_s25, %s2869_s0  ;;  %p2875_p7 = scmp.lt.s32.totalorder %s2869_s0, %s2869_s0 }
  0x30   :  { %p2876_p8 = por %p2875_p7, %p2874_p6 }
  0x32   :  { %p2877_p9 = pnand %p2876_p8, %p2870_p5 }
  0x34   :  { %2880 = shalt.err (!%p2877_p9)
}
  0x35   :  { %50 = dma.hbm_to_vmem [thread:$0]  %s3490_s2, 8192, %s45_s25, [#allocation6], %s2934_s7, %s2934_s7, %s2935_s8  }
  0x36   :  { %s2881_s17 = scalar_lea.hbm %s3492_s4, 2048 }
  0x37   :  { %p2882_p10 = scmp.ne.s32.totalorder %s3492_s4, %s2881_s17  ;;  %p2885_p11 = scmp.lt.u32.totalorder %s2881_s17, %s3492_s4 }
  0x39   :  { %p2887_p12 = pnand %p2885_p11, %p2882_p10 }
  0x3b   :  { %2890 = shalt.err (!%p2887_p12)
}
  0x3c   :  { %s2891_s23 = scalar_lea.vmem %s3010_s27, 2048  ;;  %p2896_p0 = scmp.lt.s32.totalorder %s3010_s27, %s3010_s27 }
  0x3d   :  { %p2892_p13 = scmp.ne.s32.totalorder %s3010_s27, %s2891_s23  ;;  %p2897_p1 = scmp.lt.s32.totalorder %s2891_s23, %s2891_s23 }
  0x3f   :  { %p2898_p2 = por %p2897_p1, %p2896_p0 }
  0x41   :  { %p2899_p3 = pnand %p2898_p2, %p2892_p13 }
  0x43   :  { %2902 = shalt.err (!%p2899_p3)
}
  0x44   :  { %64 = dma.hbm_to_vmem [thread:$0]  %s3492_s4, 2048, %s3010_s27, [#allocation9], %s2937_s1, %s2937_s1, %s2938_s21  }
  0x45   :  { %2925 = dma.done.wait [#allocation3], 1024  }
  0x46   :  { %2926 = vsyncadd [#allocation3], 4294966272 }
  0x47   :  { %2927 = dma.done.wait [#allocation6], 16384  }
  0x48   :  { %2928 = vsyncadd [#allocation6], 4294950912 }
  0x49   :  { %2929 = dma.done.wait [#allocation9], 2048  }
  0x4a   :  { %2930 = vsyncadd [#allocation9], 4294965248  ;;  %v2941_v0 = vmov 0.0   ;;  %v88_v1 = vld [vmem:[#allocation5 + $0x8] sm:$0xff]  ;;  %v90_v3 = vld [vmem:[#allocation5 + $0x18] sm:$0xff]  ;;  %vm2943_vm0 = vmmov 0  }
  0x4b   :  { %237 = vmatprep.mubr.f32.mxu0 %v2941_v0  ;;  %350 = vmatprep.mubr.f32.mxu1 %v2941_v0  ;;  %v92_v2 = vld [vmem:[#allocation5 + $0x28] sm:$0xff]  ;;  %v94_v5 = vld [vmem:[#allocation5 + $0x38] sm:$0xff]  ;;  %v87_v6 = vld [vmem:[#allocation5] sm:$0xff]  ;;  %s2944_s21 = smov [#allocation10]  }
  0x4c   :  { %v2011_v4 = vpack.c.bf16 %v92_v2, %v88_v1  ;;  %v91_v7 = vld [vmem:[#allocation5 + $0x20] sm:$0xff]  ;;  %v2043_v8 = vpack.c.bf16 %v94_v5, %v90_v3  ;;  %v89_v10 = vld [vmem:[#allocation5 + $0x10] sm:$0xff]  ;;  %v96_v12 = vld [vmem:[#allocation5 + $0x48] sm:$0xff]  ;;  %s1923_s24 = sshll.u32 %s2944_s21, 4  ;;  %s1924_s24 = int_to_ptr.vmem [resolvable:$true] %s1923_s24 }
  0x4d   :  { %v2013_v9 = vpack.c.bf16 %v91_v7, %v87_v6  ;;  %v93_v11 = vld [vmem:[#allocation5 + $0x30] sm:$0xff]  ;;  %v100_v14 = vld [vmem:[#allocation5 + $0x68] sm:$0xff]  ;;  %v98_v15 = vld [vmem:[#allocation5 + $0x58] sm:$0xff]  ;;  %s2903_s25 = scalar_lea.vmem %s1924_s24, 128  ;;  %p2908_p5 = scmp.lt.s32.totalorder %s1924_s24, %s1924_s24 }
  0x4e   :  { %2012 = vmatprep.subr.bf16.mxu0 %v2011_v4  ;;  %v2045_v13 = vpack.c.bf16 %v93_v11, %v89_v10  ;;  %v102_v16 = vld [vmem:[#allocation5 + $0x78] sm:$0xff]  ;;  %2044 = vmatprep.subr.bf16.mxu1 %v2043_v8  ;;  %v2015_v17 = vpack.c.bf16 %v100_v14, %v96_v12  ;;  %v95_v19 = vld [vmem:[#allocation5 + $0x40] sm:$0xff]  ;;  %v97_v21 = vld [vmem:[#allocation5 + $0x50] sm:$0xff]  ;;  %p2904_p4 = scmp.ne.s32.totalorder %s1924_s24, %s2903_s25  ;;  %p2909_p6 = scmp.lt.s32.totalorder %s2903_s25, %s2903_s25 }
  0x4f   :  { %2014 = vmatpush1.bf16.msra.mxu0 %v2013_v9  ;;  %v2047_v18 = vpack.c.bf16 %v102_v16, %v98_v15  ;;  %v99_v20 = vld [vmem:[#allocation5 + $0x60] sm:$0xff]  ;;  %v101_v23 = vld [vmem:[#allocation5 + $0x70] sm:$0xff]  ;;  %v104_v24 = vld [vmem:[#allocation5 + $0x88] sm:$0xff] }
  0x50   :  { %2046 = vmatpush1.bf16.msra.mxu1 %v2045_v13  ;;  %v2017_v22 = vpack.c.bf16 %v99_v20, %v95_v19  ;;  %v108_v25 = vld [vmem:[#allocation5 + $0xa8] sm:$0xff]  ;;  %2016 = vmatprep.subr.bf16.mxu0 %v2015_v17  ;;  %v2049_v26 = vpack.c.bf16 %v101_v23, %v97_v21  ;;  %v106_v28 = vld [vmem:[#allocation5 + $0x98] sm:$0xff]  ;;  %v103_v30 = vld [vmem:[#allocation5 + $0x80] sm:$0xff]  ;;  %p2910_p7 = por %p2909_p6, %p2908_p5 }
  0x51   :  { %2048 = vmatprep.subr.bf16.mxu1 %v2047_v18  ;;  %v2019_v27 = vpack.c.bf16 %v108_v25, %v104_v24  ;;  %v110_v29 = vld [vmem:[#allocation5 + $0xb8] sm:$0xff]  ;;  %v107_v32 = vld [vmem:[#allocation5 + $0xa0] sm:$0xff]  ;;  %v105_v33 = vld [vmem:[#allocation5 + $0x90] sm:$0xff] }
  0x52   :  { %v2051_v31 = vpack.c.bf16 %v110_v29, %v106_v28  ;;  %v109_v34 = vld [vmem:[#allocation5 + $0xb0] sm:$0xff]  ;;  %v2021_v35 = vpack.c.bf16 %v107_v32, %v103_v30  ;;  %v112_v36 = vld [vmem:[#allocation5 + $0xc8] sm:$0xff]  ;;  %v114_v38 = vld [vmem:[#allocation5 + $0xd8] sm:$0xff]  ;;  %p2911_p8 = pnand %p2910_p7, %p2904_p4 }
  0x53   :  { %2018 = vmatpush1.bf16.msra.mxu0 %v2017_v22  ;;  %v116_v37 = vld [vmem:[#allocation5 + $0xe8] sm:$0xff]  ;;  %v2053_v39 = vpack.c.bf16 %v109_v34, %v105_v33  ;;  %v118_v41 = vld [vmem:[#allocation5 + $0xf8] sm:$0xff]  ;;  %v111_v42 = vld [vmem:[#allocation5 + $0xc0] sm:$0xff] }
  0x54   :  { %2050 = vmatpush1.bf16.msra.mxu1 %v2049_v26  ;;  %2020 = vmatprep.subr.bf16.mxu0 %v2019_v27  ;;  %v2023_v40 = vpack.c.bf16 %v116_v37, %v112_v36  ;;  %v115_v43 = vld [vmem:[#allocation5 + $0xe0] sm:$0xff]  ;;  %v2055_v44 = vpack.c.bf16 %v118_v41, %v114_v38  ;;  %v113_v45 = vld [vmem:[#allocation5 + $0xd0] sm:$0xff]  ;;  %v120_v47 = vld [vmem:[#allocation5 + $0x108] sm:$0xff] }
  0x55   :  { %2052 = vmatprep.subr.bf16.mxu1 %v2051_v31  ;;  %v117_v46 = vld [vmem:[#allocation5 + $0xf0] sm:$0xff]  ;;  %v124_v48 = vld [vmem:[#allocation5 + $0x128] sm:$0xff]  ;;  %v122_v49 = vld [vmem:[#allocation5 + $0x118] sm:$0xff]  ;;  %v2025_v51 = vpack.c.bf16 %v115_v43, %v111_v42 }
  0x56   :  { %v126_v50 = vld [vmem:[#allocation5 + $0x138] sm:$0xff]  ;;  %v2057_v52 = vpack.c.bf16 %v117_v46, %v113_v45  ;;  %v2027_v53 = vpack.c.bf16 %v124_v48, %v120_v47  ;;  %v119_v54 = vld [vmem:[#allocation5 + $0x100] sm:$0xff]  ;;  %v121_v56 = vld [vmem:[#allocation5 + $0x110] sm:$0xff] }
  0x57   :  { %2022 = vmatpush1.bf16.msra.mxu0 %v2021_v35  ;;  %v123_v55 = vld [vmem:[#allocation5 + $0x120] sm:$0xff]  ;;  %v2059_v57 = vpack.c.bf16 %v126_v50, %v122_v49  ;;  %v125_v58 = vld [vmem:[#allocation5 + $0x130] sm:$0xff]  ;;  %v128_v59 = vld [vmem:[#allocation5 + $0x148] sm:$0xff] }
  0x58   :  { %2054 = vmatpush1.bf16.msra.mxu1 %v2053_v39  ;;  %2024 = vmatprep.subr.bf16.mxu0 %v2023_v40  ;;  %v132_v60 = vld [vmem:[#allocation5 + $0x168] sm:$0xff]  ;;  %v130_v61 = vld [vmem:[#allocation5 + $0x158] sm:$0xff]  ;;  %v2029_v63 = vpack.c.bf16 %v123_v55, %v119_v54  ;;  %v2061_v1 = vpack.c.bf16 %v125_v58, %v121_v56  ;;  %v127_v3 = vld [vmem:[#allocation5 + $0x140] sm:$0xff] }
  0x59   :  { %2056 = vmatprep.subr.bf16.mxu1 %v2055_v44  ;;  %v134_v62 = vld [vmem:[#allocation5 + $0x178] sm:$0xff]  ;;  %v2031_v2 = vpack.c.bf16 %v132_v60, %v128_v59  ;;  %v131_v4 = vld [vmem:[#allocation5 + $0x160] sm:$0xff]  ;;  %v129_v5 = vld [vmem:[#allocation5 + $0x150] sm:$0xff] }
  0x5a   :  { %v2063_v6 = vpack.c.bf16 %v134_v62, %v130_v61  ;;  %v133_v7 = vld [vmem:[#allocation5 + $0x170] sm:$0xff]  ;;  %v136_v8 = vld [vmem:[#allocation5 + $0x188] sm:$0xff]  ;;  %v138_v10 = vld [vmem:[#allocation5 + $0x198] sm:$0xff]  ;;  %v2033_v12 = vpack.c.bf16 %v131_v4, %v127_v3 }
  0x5b   :  { %2026 = vmatpush1.bf16.msra.mxu0 %v2025_v51  ;;  %v140_v9 = vld [vmem:[#allocation5 + $0x1a8] sm:$0xff]  ;;  %v142_v11 = vld [vmem:[#allocation5 + $0x1b8] sm:$0xff]  ;;  %v2065_v13 = vpack.c.bf16 %v133_v7, %v129_v5  ;;  %v135_v15 = vld [vmem:[#allocation5 + $0x180] sm:$0xff] }
  0x5c   :  { %2058 = vmatpush1.bf16.msra.mxu1 %v2057_v52  ;;  %2028 = vmatprep.subr.bf16.mxu0 %v2027_v53  ;;  %v2035_v14 = vpack.c.bf16 %v140_v9, %v136_v8  ;;  %v139_v16 = vld [vmem:[#allocation5 + $0x1a0] sm:$0xff]  ;;  %v137_v17 = vld [vmem:[#allocation5 + $0x190] sm:$0xff]  ;;  %v2067_v18 = vpack.c.bf16 %v142_v11, %v138_v10  ;;  %v144_v20 = vld [vmem:[#allocation5 + $0x1c8] sm:$0xff] }
  0x5d   :  { %2060 = vmatprep.subr.bf16.mxu1 %v2059_v57  ;;  %v141_v19 = vld [vmem:[#allocation5 + $0x1b0] sm:$0xff]  ;;  %v148_v21 = vld [vmem:[#allocation5 + $0x1e8] sm:$0xff]  ;;  %v146_v22 = vld [vmem:[#allocation5 + $0x1d8] sm:$0xff]  ;;  %v2037_v24 = vpack.c.bf16 %v139_v16, %v135_v15 }
  0x5e   :  { %v150_v23 = vld [vmem:[#allocation5 + $0x1f8] sm:$0xff]  ;;  %v2069_v25 = vpack.c.bf16 %v141_v19, %v137_v17  ;;  %v2039_v26 = vpack.c.bf16 %v148_v21, %v144_v20  ;;  %v143_v27 = vld [vmem:[#allocation5 + $0x1c0] sm:$0xff]  ;;  %v145_v29 = vld [vmem:[#allocation5 + $0x1d0] sm:$0xff] }
  0x5f   :  { %2030 = vmatpush1.bf16.msra.mxu0 %v2029_v63  ;;  %v147_v28 = vld [vmem:[#allocation5 + $0x1e0] sm:$0xff]  ;;  %v2071_v30 = vpack.c.bf16 %v150_v23, %v146_v22  ;;  %v149_v31 = vld [vmem:[#allocation5 + $0x1f0] sm:$0xff]  ;;  %v400_v32 = vld [vmem:[#allocation7 + $0x8] sm:$0xff] }
  0x60   :  { %2062 = vmatpush1.bf16.msra.mxu1 %v2061_v1  ;;  %2032 = vmatprep.subr.bf16.mxu0 %v2031_v2  ;;  %v404_v33 = vld [vmem:[#allocation7 + $0x28] sm:$0xff]  ;;  %v402_v34 = vld [vmem:[#allocation7 + $0x18] sm:$0xff]  ;;  %v2041_v36 = vpack.c.bf16 %v147_v28, %v143_v27  ;;  %v2073_v37 = vpack.c.bf16 %v149_v31, %v145_v29  ;;  %v399_v39 = vld [vmem:[#allocation7] sm:$0xff] }
  0x61   :  { %2064 = vmatprep.subr.bf16.mxu1 %v2063_v6  ;;  %v406_v35 = vld [vmem:[#allocation7 + $0x38] sm:$0xff]  ;;  %v3049_v38 = vpack.c.bf16 %v404_v33, %v400_v32  ;;  %v403_v40 = vld [vmem:[#allocation7 + $0x20] sm:$0xff]  ;;  %v401_v42 = vld [vmem:[#allocation7 + $0x10] sm:$0xff] }
  0x62   :  { %v3051_v41 = vpack.c.bf16 %v406_v35, %v402_v34  ;;  %v405_v43 = vld [vmem:[#allocation7 + $0x30] sm:$0xff]  ;;  %v408_v44 = vld [vmem:[#allocation7 + $0x48] sm:$0xff]  ;;  %v79_v46 = vld [vmem:[#allocation2] sm:$0xff]  ;;  %v3053_v47 = vpack.c.bf16 %v403_v40, %v399_v39 }
  0x63   :  { %2034 = vmatpush1.bf16.msra.mxu0 %v2033_v12  ;;  %v412_v45 = vld [vmem:[#allocation7 + $0x68] sm:$0xff]  ;;  %v410_v48 = vld [vmem:[#allocation7 + $0x58] sm:$0xff]  ;;  %v3056_v50 = vpack.c.bf16 %v405_v43, %v401_v42  ;;  %v407_v51 = vld [vmem:[#allocation7 + $0x40] sm:$0xff] }
  0x64   :  { %2066 = vmatpush1.bf16.msra.mxu1 %v2065_v13  ;;  %2036 = vmatprep.subr.bf16.mxu0 %v2035_v14  ;;  %v414_v49 = vld [vmem:[#allocation7 + $0x78] sm:$0xff]  ;;  %v411_v52 = vld [vmem:[#allocation7 + $0x60] sm:$0xff]  ;;  %v3059_v53 = vpack.c.bf16 %v412_v45, %v408_v44  ;;  %v409_v54 = vld [vmem:[#allocation7 + $0x50] sm:$0xff] }
  0x65   :  { %2068 = vmatprep.subr.bf16.mxu1 %v2067_v18  ;;  %v413_v55 = vld [vmem:[#allocation7 + $0x70] sm:$0xff]  ;;  %v3061_v56 = vpack.c.bf16 %v414_v49, %v410_v48  ;;  %v416_v57 = vld [vmem:[#allocation7 + $0x88] sm:$0xff]  ;;  %v3064_v60 = vpack.c.bf16 %v411_v52, %v407_v51  ;;  %v418_v61 = vld [vmem:[#allocation7 + $0x98] sm:$0xff] }
  0x66   :  { %v420_v58 = vld [vmem:[#allocation7 + $0xa8] sm:$0xff]  ;;  %v422_v62 = vld [vmem:[#allocation7 + $0xb8] sm:$0xff]  ;;  %v3068_v63 = vpack.c.bf16 %v413_v55, %v409_v54  ;;  %v415_v1 = vld [vmem:[#allocation7 + $0x80] sm:$0xff] }
  0x67   :  { %2038 = vmatpush1.bf16.msra.mxu0 %v2037_v24  ;;  %v80_v59 = vld [vmem:[#allocation2 + $0x8] sm:$0xff]  ;;  %v419_v2 = vld [vmem:[#allocation7 + $0xa0] sm:$0xff]  ;;  %v3072_v3 = vpack.c.bf16 %v420_v58, %v416_v57  ;;  %v417_v4 = vld [vmem:[#allocation7 + $0x90] sm:$0xff]  ;;  %v3075_v6 = vpack.c.bf16 %v422_v62, %v418_v61 }
  0x68   :  { %2070 = vmatpush1.bf16.msra.mxu1 %v2069_v25  ;;  %2040 = vmatprep.subr.bf16.mxu0 %v2039_v26  ;;  %v421_v5 = vld [vmem:[#allocation7 + $0xb0] sm:$0xff]  ;;  %v424_v7 = vld [vmem:[#allocation7 + $0xc8] sm:$0xff]  ;;  %v3078_v10 = vpack.c.bf16 %v419_v2, %v415_v1  ;;  %v426_v11 = vld [vmem:[#allocation7 + $0xd8] sm:$0xff] }
  0x69   :  { %2072 = vmatprep.subr.bf16.mxu1 %v2071_v30  ;;  %v428_v8 = vld [vmem:[#allocation7 + $0xe8] sm:$0xff]  ;;  %v81_v9 = vld [vmem:[#allocation2 + $0x10] sm:$0xff]  ;;  %v430_v12 = vld [vmem:[#allocation7 + $0xf8] sm:$0xff]  ;;  %v3082_v13 = vpack.c.bf16 %v421_v5, %v417_v4 }
  0x6a   :  { %v423_v14 = vld [vmem:[#allocation7 + $0xc0] sm:$0xff]  ;;  %v3086_v16 = vpack.c.bf16 %v428_v8, %v424_v7  ;;  %v425_v17 = vld [vmem:[#allocation7 + $0xd0] sm:$0xff]  ;;  %v3089_v19 = vpack.c.bf16 %v430_v12, %v426_v11  ;;  %v432_v20 = vld [vmem:[#allocation7 + $0x108] sm:$0xff] }
  0x6b   :  { %2042 = vmatpush1.bf16.msra.mxu0 %v2041_v36  ;;  %v427_v15 = vld [vmem:[#allocation7 + $0xe0] sm:$0xff]  ;;  %v429_v18 = vld [vmem:[#allocation7 + $0xf0] sm:$0xff]  ;;  %v436_v21 = vld [vmem:[#allocation7 + $0x128] sm:$0xff] }
  0x6c   :  { %2074 = vmatpush1.bf16.msra.mxu1 %v2073_v37  ;;  %2076 = vmatprep.subr.bf16.mxu0 %v3049_v38  ;;  %v82_v22 = vld [vmem:[#allocation2 + $0x18] sm:$0xff]  ;;  %v3092_v23 = vpack.c.bf16 %v427_v15, %v423_v14  ;;  %v3096_v26 = vpack.c.bf16 %v429_v18, %v425_v17  ;;  %v431_v27 = vld [vmem:[#allocation7 + $0x100] sm:$0xff]  ;;  %v3100_v29 = vpack.c.bf16 %v436_v21, %v432_v20  ;;  %v433_v30 = vld [vmem:[#allocation7 + $0x110] sm:$0xff] }
  0x6d   :  { %2108 = vmatprep.subr.bf16.mxu1 %v3051_v41  ;;  %v434_v24 = vld [vmem:[#allocation7 + $0x118] sm:$0xff]  ;;  %v435_v28 = vld [vmem:[#allocation7 + $0x120] sm:$0xff]  ;;  %v437_v31 = vld [vmem:[#allocation7 + $0x130] sm:$0xff] }
  0x6e   :  { %238 = vmatmul.mubr.f32.vlgmr.msra.gmra.mrb[0].mxu0 %v79_v46  ;;  %v438_v25 = vld [vmem:[#allocation7 + $0x138] sm:$0xff]  ;;  %v440_v33 = vld [vmem:[#allocation7 + $0x148] sm:$0xff]  ;;  %v83_v35 = vld [vmem:[#allocation2 + $0x20] sm:$0xff]  ;;  %v3106_v36 = vpack.c.bf16 %v435_v28, %v431_v27  ;;  %v3110_v40 = vpack.c.bf16 %v437_v31, %v433_v30  ;;  %v153_v28 = vlaneseq }
  0x6f   :  { %351 = vmatmul.mubr.f32.vlgmr.msra.gmra.mrb[0].mxu1 %v79_v46  ;;  %2078 = vmatpush1.bf16.msra.mxu0 %v3053_v47  ;;  %v3103_v32 = vpack.c.bf16 %v438_v25, %v434_v24  ;;  %v444_v34 = vld [vmem:[#allocation7 + $0x168] sm:$0xff]  ;;  %v442_v37 = vld [vmem:[#allocation7 + $0x158] sm:$0xff]  ;;  %v439_v42 = vld [vmem:[#allocation7 + $0x140] sm:$0xff] }
  0x70   :  { %2110 = vmatpush1.bf16.msra.mxu1 %v3056_v50  ;;  %243 = vmatprep.mubr.f32.mxu0 %v2941_v0  ;;  %v446_v39 = vld [vmem:[#allocation7 + $0x178] sm:$0xff]  ;;  %v443_v43 = vld [vmem:[#allocation7 + $0x160] sm:$0xff]  ;;  %v3114_v44 = vpack.c.bf16 %v444_v34, %v440_v33  ;;  %v441_v45 = vld [vmem:[#allocation7 + $0x150] sm:$0xff]  ;;  %v154_v30 = vshrl.u32 %v153_v28, 7 }
  0x71   :  { %356 = vmatprep.mubr.f32.mxu1 %v2941_v0  ;;  %2080 = vmatprep.subr.bf16.mxu0 %v3059_v53  ;;  %v445_v46 = vld [vmem:[#allocation7 + $0x170] sm:$0xff]  ;;  %v3117_v48 = vpack.c.bf16 %v446_v39, %v442_v37  ;;  %v448_v49 = vld [vmem:[#allocation7 + $0x188] sm:$0xff]  ;;  %v3120_v54 = vpack.c.bf16 %v443_v43, %v439_v42  ;;  %v450_v55 = vld [vmem:[#allocation7 + $0x198] sm:$0xff] }
  0x72   :  { %244 = vmatmul.mubr.f32.gmra.mrb[2].mxu0 %v80_v59  ;;  %2112 = vmatprep.subr.bf16.mxu1 %v3061_v56  ;;  %v452_v51 = vld [vmem:[#allocation7 + $0x1a8] sm:$0xff]  ;;  %v454_v57 = vld [vmem:[#allocation7 + $0x1b8] sm:$0xff]  ;;  %v3124_v58 = vpack.c.bf16 %v445_v46, %v441_v45  ;;  %v451_v61 = vld [vmem:[#allocation7 + $0x1a0] sm:$0xff]  ;;  %v155_v31 = vsub.s32 0, %v154_v30  ;;  %v159_v34 = vsub.s32 1, %v154_v30  ;;  %v167_v42 = vsub.s32 3, %v154_v30 }
  0x73   :  { %357 = vmatmul.mubr.f32.gmra.mrb[2].mxu1 %v80_v59  ;;  %2082 = vmatpush1.bf16.msra.mxu0 %v3064_v60  ;;  %v84_v52 = vld [vmem:[#allocation2 + $0x28] sm:$0xff]  ;;  %v447_v59 = vld [vmem:[#allocation7 + $0x180] sm:$0xff]  ;;  %v3128_v62 = vpack.c.bf16 %v452_v51, %v448_v49  ;;  %v449_v1 = vld [vmem:[#allocation7 + $0x190] sm:$0xff]  ;;  %v3131_v4 = vpack.c.bf16 %v454_v57, %v450_v55 }
  0x74   :  { %2114 = vmatpush1.bf16.msra.mxu1 %v3068_v63  ;;  %249 = vmatprep.mubr.f32.mxu0 %v2941_v0  ;;  %v453_v2 = vld [vmem:[#allocation7 + $0x1b0] sm:$0xff]  ;;  %v456_v5 = vld [vmem:[#allocation7 + $0x1c8] sm:$0xff]  ;;  %v458_v11 = vld [vmem:[#allocation7 + $0x1d8] sm:$0xff] }
  0x75   :  { %362 = vmatprep.mubr.f32.mxu1 %v2941_v0  ;;  %2084 = vmatprep.subr.bf16.mxu0 %v3072_v3  ;;  %v460_v7 = vld [vmem:[#allocation7 + $0x1e8] sm:$0xff]  ;;  %v85_v8 = vld [vmem:[#allocation2 + $0x30] sm:$0xff]  ;;  %v462_v12 = vld [vmem:[#allocation7 + $0x1f8] sm:$0xff]  ;;  %v3138_v14 = vpack.c.bf16 %v453_v2, %v449_v1 }
  0x76   :  { %250 = vmatmul.mubr.f32.gmra.mrb[4].mxu0 %v81_v9  ;;  %2116 = vmatprep.subr.bf16.mxu1 %v3075_v6  ;;  %v455_v15 = vld [vmem:[#allocation7 + $0x1c0] sm:$0xff]  ;;  %v3142_v18 = vpack.c.bf16 %v460_v7, %v456_v5  ;;  %v457_v20 = vld [vmem:[#allocation7 + $0x1d0] sm:$0xff]  ;;  %v86_v24 = vld [vmem:[#allocation2 + $0x38] sm:$0xff] }
  0x77   :  { %363 = vmatmul.mubr.f32.gmra.mrb[4].mxu1 %v81_v9  ;;  %2086 = vmatpush1.bf16.msra.mxu0 %v3078_v10  ;;  %v3134_v9 = vpack.c.bf16 %v451_v61, %v447_v59  ;;  %v459_v17 = vld [vmem:[#allocation7 + $0x1e0] sm:$0xff]  ;;  %v461_v21 = vld [vmem:[#allocation7 + $0x1f0] sm:$0xff]  ;;  %v163_v59 = vsub.s32 2, %v154_v30 }
  0x78   :  { %2118 = vmatpush1.bf16.msra.mxu1 %v3082_v13  ;;  %255 = vmatprep.mubr.f32.mxu0 %v2941_v0  ;;  %v3148_v25 = vpack.c.bf16 %v459_v17, %v455_v15  ;;  %v3152_v27 = vpack.c.bf16 %v461_v21, %v457_v20  ;;  %v151_v33 = vld [vmem:[%s3491_s3] sm:$0xf] }
  0x79   :  { %368 = vmatprep.mubr.f32.mxu1 %v2941_v0  ;;  %2088 = vmatprep.subr.bf16.mxu0 %v3086_v16  ;;  %v3204_v37 = vrot.slane %v151_v33, %v159_v34  ;;  %v3208_v57 = vrot.slane %v151_v33, %v167_v42  ;;  %v3211_v1 = vrot.slane %v151_v33, %v163_v59 }
  0x7a   :  { %256 = vmatmul.mubr.f32.gmra.mrb[6].mxu0 %v82_v22  ;;  %2120 = vmatprep.subr.bf16.mxu1 %v3089_v19 }
  0x7b   :  { %369 = vmatmul.mubr.f32.gmra.mrb[6].mxu1 %v82_v22  ;;  %2090 = vmatpush1.bf16.msra.mxu0 %v3092_v23  ;;  %v3145_v22 = vpack.c.bf16 %v462_v12, %v458_v11 }
  0x7c   :  { %2122 = vmatpush1.bf16.msra.mxu1 %v3096_v26  ;;  %261 = vmatprep.mubr.f32.mxu0 %v2941_v0 }
  0x7d   :  { %374 = vmatprep.mubr.f32.mxu1 %v2941_v0  ;;  %2092 = vmatprep.subr.bf16.mxu0 %v3100_v29 }
  0x7e   :  { %262 = vmatmul.mubr.f32.gmra.mrb[8].mxu0 %v83_v35  ;;  %2124 = vmatprep.subr.bf16.mxu1 %v3103_v32 }
  0x7f   :  { %375 = vmatmul.mubr.f32.gmra.mrb[8].mxu1 %v83_v35  ;;  %2094 = vmatpush1.bf16.msra.mxu0 %v3106_v36  ;;  %v3202_v35 = vrot.slane %v151_v33, %v155_v31 }
  0x80   :  { %2126 = vmatpush1.bf16.msra.mxu1 %v3110_v40  ;;  %267 = vmatprep.mubr.f32.mxu0 %v2941_v0 }
  0x81   :  { %380 = vmatprep.mubr.f32.mxu1 %v2941_v0  ;;  %2096 = vmatprep.subr.bf16.mxu0 %v3114_v44 }
  0x82   :  { %268 = vmatmul.mubr.f32.gmra.mrb[10].mxu0 %v84_v52  ;;  %2128 = vmatprep.subr.bf16.mxu1 %v3117_v48 }
  0x83   :  { %381 = vmatmul.mubr.f32.gmra.mrb[10].mxu1 %v84_v52  ;;  %2098 = vmatpush1.bf16.msra.mxu0 %v3120_v54 }
  0x84   :  { %2130 = vmatpush1.bf16.msra.mxu1 %v3124_v58  ;;  %273 = vmatprep.mubr.f32.mxu0 %v2941_v0 }
  0x85   :  { %386 = vmatprep.mubr.f32.mxu1 %v2941_v0  ;;  %2100 = vmatprep.subr.bf16.mxu0 %v3128_v62 }
  0x86   :  { %274 = vmatmul.mubr.f32.gmra.mrb[12].mxu0 %v85_v8  ;;  %2132 = vmatprep.subr.bf16.mxu1 %v3131_v4 }
  0x87   :  { %387 = vmatmul.mubr.f32.gmra.mrb[12].mxu1 %v85_v8  ;;  %2102 = vmatpush1.bf16.msra.mxu0 %v3134_v9 }
  0x88   :  { %2134 = vmatpush1.bf16.msra.mxu1 %v3138_v14  ;;  %279 = vmatprep.mubr.f32.mxu0 %v2941_v0 }
  0x89   :  { %392 = vmatprep.mubr.f32.mxu1 %v2941_v0  ;;  %2104 = vmatprep.subr.bf16.mxu0 %v3142_v18 }
  0x8a   :  { %280 = vmatmul.mubr.f32.gmra.mrb[14].mxu0 %v86_v24  ;;  %2136 = vmatprep.subr.bf16.mxu1 %v3145_v22 }
  0x8b   :  { %393 = vmatmul.mubr.f32.gmra.mrb[14].mxu1 %v86_v24  ;;  %2106 = vmatpush1.bf16.msra.mxu0 %v3148_v25 }
  0x8c   :  { %2138 = vmatpush1.bf16.msra.mxu1 %v3152_v27  ;;  %527 = vmatprep.mubr.f32.mxu0 %v2941_v0 }
  0x8d   :  { %598 = vmatprep.mubr.f32.mxu1 %v2941_v0  ;;  %2140 = vmatprep.subr.bf16.mxu0 %v3049_v38 }
  0x8e   :  { %528 = vmatmul.mubr.f32.vlgmr.msra.gmra.mrb[0].mxu0 %v2941_v0  ;;  %2172 = vmatprep.subr.bf16.mxu1 %v3051_v41 }
  0x8f   :  { %599 = vmatmul.mubr.f32.vlgmr.msra.gmra.mrb[0].mxu1 %v2941_v0  ;;  %2142 = vmatpush1.bf16.msra.mxu0 %v3053_v47 }
  0x90   :  { %2174 = vmatpush1.bf16.msra.mxu1 %v3056_v50  ;;  %2144 = vmatprep.subr.bf16.mxu0 %v3059_v53 }
  0x91   :  { %2176 = vmatprep.subr.bf16.mxu1 %v3061_v56  ;;  %697 = vmatprep.mubr.f32.mxu0 %v2941_v0 }
  0x92   :  { %768 = vmatprep.mubr.f32.mxu1 %v2941_v0 }
  0x93   :  { %2146 = vmatpush1.bf16.msra.mxu0 %v3064_v60 }
  0x94   :  { %2178 = vmatpush1.bf16.msra.mxu1 %v3068_v63  ;;  %2148 = vmatprep.subr.bf16.mxu0 %v3072_v3 }
  0x95   :  { %2180 = vmatprep.subr.bf16.mxu1 %v3075_v6 }
  0x97   :  { %2150 = vmatpush1.bf16.msra.mxu0 %v3078_v10 }
  0x98   :  { %2182 = vmatpush1.bf16.msra.mxu1 %v3082_v13  ;;  %2152 = vmatprep.subr.bf16.mxu0 %v3086_v16 }
  0x99   :  { %2184 = vmatprep.subr.bf16.mxu1 %v3089_v19 }
  0x9b   :  { %2154 = vmatpush1.bf16.msra.mxu0 %v3092_v23 }
  0x9c   :  { %2186 = vmatpush1.bf16.msra.mxu1 %v3096_v26  ;;  %2156 = vmatprep.subr.bf16.mxu0 %v3100_v29 }
  0x9d   :  { %2188 = vmatprep.subr.bf16.mxu1 %v3103_v32 }
  0x9f   :  { %2158 = vmatpush1.bf16.msra.mxu0 %v3106_v36 }
  0xa0   :  { %2190 = vmatpush1.bf16.msra.mxu1 %v3110_v40  ;;  %2160 = vmatprep.subr.bf16.mxu0 %v3114_v44 }
  0xa1   :  { %2192 = vmatprep.subr.bf16.mxu1 %v3117_v48 }
  0xa3   :  { %2162 = vmatpush1.bf16.msra.mxu0 %v3120_v54 }
  0xa4   :  { %2194 = vmatpush1.bf16.msra.mxu1 %v3124_v58  ;;  %2164 = vmatprep.subr.bf16.mxu0 %v3128_v62 }
  0xa5   :  { %2196 = vmatprep.subr.bf16.mxu1 %v3131_v4 }
  0xa7   :  { %2166 = vmatpush1.bf16.msra.mxu0 %v3134_v9 }
  0xa8   :  { %2198 = vmatpush1.bf16.msra.mxu1 %v3138_v14  ;;  %2168 = vmatprep.subr.bf16.mxu0 %v3142_v18 }
  0xa9   :  { %2200 = vmatprep.subr.bf16.mxu1 %v3145_v22 }
  0xab   :  { %2170 = vmatpush1.bf16.msra.mxu0 %v3148_v25 }
  0xac   :  { %2202 = vmatpush1.bf16.msra.mxu1 %v3152_v27  ;;  %2204 = vmatprep.subr.bf16.mxu0 %v3049_v38 }
  0xad   :  { %2236 = vmatprep.subr.bf16.mxu1 %v3051_v41 }
 0x161   :  { %v529_v39 = vpop.f32.mrb[0].mxu0 }
 0x162   :  { %v2611_v43 = vadd.f32 %v529_v39, %v3202_v35  ;;  %v600_v45 = vpop.f32.mrb[0].mxu1  ;;  %v531_v46 = vpop.f32.mrb[1].mxu0 }
 0x163   :  { %v2612_v49 = vadd.f32 %v531_v46, %v3204_v37  ;;  %v602_v51 = vpop.f32.mrb[1].mxu1  ;;  %v2627_v5 = vadd.f32 %v600_v45, %v3211_v1 }
 0x164   :  { %v1934_v52 = vmul.f32 -1.442695, %v2611_v43  ;;  %v2628_v61 = vadd.f32 %v602_v51, %v3208_v57 }
 0x165   :  { %v1935_v55 = vmul.f32 -1.442695, %v2612_v49 }
 0x166   :  { %2687 = vpow2.f32 %v1934_v52  ;;  %v1936_v2 = vmul.f32 -1.442695, %v2628_v61 }
 0x167   :  { %2689 = vpow2.f32 %v1935_v55 }
 0x168   :  { %2691 = vpow2.f32 %v1936_v2 }
 0x169   :  { %2693 = vtanh.f32 %v2627_v5 }
 0x170   :  { %v2688_v7 = vpop.eup %2687 }
 0x171   :  { %v2690_v8 = vpop.eup %2689  ;;  %v612_v11 = vadd.f32 1.0, %v2688_v7 }
 0x172   :  { %v618_v12 = vadd.f32 1.0, %v2690_v8  ;;  %v2692_v15 = vpop.eup %2691 }
 0x173   :  { %2695 = vrcp.f32 %v612_v11  ;;  %v2694_v17 = vpop.eup %2693  ;;  %v625_v28 = vadd.f32 1.0, %v2692_v15 }
 0x174   :  { %2697 = vrcp.f32 %v618_v12 }
 0x175   :  { %2699 = vrcp.f32 %v625_v28 }
 0x17d   :  { %v2696_v20 = vpop.eup %2695 }
 0x17e   :  { %v2698_v21 = vpop.eup %2697  ;;  %v629_v24 = vmul.f32 %v2696_v20, %v2694_v17 }
 0x17f   :  { %v628_v30 = vmul.f32 0.0, %v2698_v21  ;;  %v2700_v33 = vpop.eup %2699 }
 0x181   :  { %v3214_v31 = vadd.f32 %v629_v24, %v628_v30 }
 0x183   :  { %2701 = vtanh.f32 %v3214_v31 }
 0x18d   :  { %v2702_v34 = vpop.eup %2701 }
 0x18e   :  { %v632_v39 = vmul.f32 %v2702_v34, %v2700_v33 }
 0x190   :  { %698 = vmatmul.mubr.f32.vlgmr.msra.gmra.mrb[2].mxu0 %v632_v39  ;;  %769 = vmatmul.mubr.f32.vlgmr.msra.gmra.mrb[2].mxu1 %v632_v39 }
 0x191   :  { %2206 = vmatpush1.bf16.msra.mxu0 %v3053_v47  ;;  %2238 = vmatpush1.bf16.msra.mxu1 %v3056_v50 }
 0x192   :  { %2208 = vmatprep.subr.bf16.mxu0 %v3059_v53  ;;  %2240 = vmatprep.subr.bf16.mxu1 %v3061_v56 }
 0x193   :  { %867 = vmatprep.mubr.f32.mxu0 %v2941_v0  ;;  %938 = vmatprep.mubr.f32.mxu1 %v2941_v0 }
 0x195   :  { %2210 = vmatpush1.bf16.msra.mxu0 %v3064_v60  ;;  %2242 = vmatpush1.bf16.msra.mxu1 %v3068_v63 }
 0x196   :  { %2212 = vmatprep.subr.bf16.mxu0 %v3072_v3  ;;  %2244 = vmatprep.subr.bf16.mxu1 %v3075_v6 }
 0x199   :  { %2214 = vmatpush1.bf16.msra.mxu0 %v3078_v10  ;;  %2246 = vmatpush1.bf16.msra.mxu1 %v3082_v13 }
 0x19a   :  { %2216 = vmatprep.subr.bf16.mxu0 %v3086_v16  ;;  %2248 = vmatprep.subr.bf16.mxu1 %v3089_v19 }
 0x19d   :  { %2218 = vmatpush1.bf16.msra.mxu0 %v3092_v23  ;;  %2250 = vmatpush1.bf16.msra.mxu1 %v3096_v26 }
 0x19e   :  { %2220 = vmatprep.subr.bf16.mxu0 %v3100_v29  ;;  %2252 = vmatprep.subr.bf16.mxu1 %v3103_v32 }
 0x1a1   :  { %2222 = vmatpush1.bf16.msra.mxu0 %v3106_v36  ;;  %2254 = vmatpush1.bf16.msra.mxu1 %v3110_v40 }
 0x1a2   :  { %2224 = vmatprep.subr.bf16.mxu0 %v3114_v44  ;;  %2256 = vmatprep.subr.bf16.mxu1 %v3117_v48 }
 0x1a5   :  { %2226 = vmatpush1.bf16.msra.mxu0 %v3120_v54  ;;  %2258 = vmatpush1.bf16.msra.mxu1 %v3124_v58 }
 0x1a6   :  { %2228 = vmatprep.subr.bf16.mxu0 %v3128_v62  ;;  %2260 = vmatprep.subr.bf16.mxu1 %v3131_v4 }
 0x1a9   :  { %2230 = vmatpush1.bf16.msra.mxu0 %v3134_v9  ;;  %2262 = vmatpush1.bf16.msra.mxu1 %v3138_v14 }
 0x1aa   :  { %2232 = vmatprep.subr.bf16.mxu0 %v3142_v18  ;;  %2264 = vmatprep.subr.bf16.mxu1 %v3145_v22 }
 0x1ad   :  { %2234 = vmatpush1.bf16.msra.mxu0 %v3148_v25  ;;  %2266 = vmatpush1.bf16.msra.mxu1 %v3152_v27 }
 0x1ae   :  { %2268 = vmatprep.subr.bf16.mxu0 %v3049_v38  ;;  %2300 = vmatprep.subr.bf16.mxu1 %v3051_v41 }
 0x263   :  { %v699_v42 = vpop.f32.mrb[2].mxu0  ;;  %v770_v43 = vpop.f32.mrb[2].mxu1 }
 0x264   :  { %v2613_v45 = vadd.f32 %v699_v42, %v3202_v35  ;;  %v701_v46 = vpop.f32.mrb[3].mxu0  ;;  %v772_v49 = vpop.f32.mrb[3].mxu1  ;;  %v2629_v2 = vadd.f32 %v770_v43, %v3211_v1 }
 0x265   :  { %v2614_v51 = vadd.f32 %v701_v46, %v3204_v37  ;;  %v2630_v59 = vadd.f32 %v772_v49, %v3208_v57 }
 0x266   :  { %v1937_v52 = vmul.f32 -1.442695, %v2613_v45 }
 0x267   :  { %v1938_v55 = vmul.f32 -1.442695, %v2614_v51  ;;  %v1939_v61 = vmul.f32 -1.442695, %v2630_v59 }
 0x268   :  { %2703 = vpow2.f32 %v1937_v52 }
 0x269   :  { %2705 = vpow2.f32 %v1938_v55 }
 0x26a   :  { %2707 = vpow2.f32 %v1939_v61 }
 0x26b   :  { %2709 = vtanh.f32 %v2629_v2 }
 0x272   :  { %v2704_v5 = vpop.eup %2703 }
 0x273   :  { %v2706_v7 = vpop.eup %2705  ;;  %v782_v8 = vadd.f32 1.0, %v2704_v5 }
 0x274   :  { %v788_v11 = vadd.f32 1.0, %v2706_v7  ;;  %v2708_v12 = vpop.eup %2707 }
 0x275   :  { %2711 = vrcp.f32 %v782_v8  ;;  %v2710_v15 = vpop.eup %2709  ;;  %v795_v24 = vadd.f32 1.0, %v2708_v12 }
 0x276   :  { %2713 = vrcp.f32 %v788_v11 }
 0x277   :  { %2715 = vrcp.f32 %v795_v24 }
 0x27f   :  { %v2712_v17 = vpop.eup %2711 }
 0x280   :  { %v2714_v20 = vpop.eup %2713  ;;  %v799_v21 = vmul.f32 %v2712_v17, %v2710_v15 }
 0x281   :  { %v798_v28 = vmul.f32 %v2714_v20, %v3214_v31  ;;  %v2716_v33 = vpop.eup %2715 }
 0x283   :  { %v3256_v30 = vadd.f32 %v799_v21, %v798_v28 }
 0x285   :  { %2717 = vtanh.f32 %v3256_v30 }
 0x28f   :  { %v2718_v34 = vpop.eup %2717 }
 0x290   :  { %v802_v39 = vmul.f32 %v2718_v34, %v2716_v33 }
 0x292   :  { %868 = vmatmul.mubr.f32.vlgmr.msra.gmra.mrb[4].mxu0 %v802_v39  ;;  %939 = vmatmul.mubr.f32.vlgmr.msra.gmra.mrb[4].mxu1 %v802_v39 }
 0x293   :  { %2270 = vmatpush1.bf16.msra.mxu0 %v3053_v47  ;;  %2302 = vmatpush1.bf16.msra.mxu1 %v3056_v50 }
 0x294   :  { %2272 = vmatprep.subr.bf16.mxu0 %v3059_v53  ;;  %2304 = vmatprep.subr.bf16.mxu1 %v3061_v56 }
 0x295   :  { %1037 = vmatprep.mubr.f32.mxu0 %v2941_v0  ;;  %1108 = vmatprep.mubr.f32.mxu1 %v2941_v0 }
 0x297   :  { %2274 = vmatpush1.bf16.msra.mxu0 %v3064_v60  ;;  %2306 = vmatpush1.bf16.msra.mxu1 %v3068_v63 }
 0x298   :  { %2276 = vmatprep.subr.bf16.mxu0 %v3072_v3  ;;  %2308 = vmatprep.subr.bf16.mxu1 %v3075_v6 }
 0x29b   :  { %2278 = vmatpush1.bf16.msra.mxu0 %v3078_v10  ;;  %2310 = vmatpush1.bf16.msra.mxu1 %v3082_v13 }
 0x29c   :  { %2280 = vmatprep.subr.bf16.mxu0 %v3086_v16  ;;  %2312 = vmatprep.subr.bf16.mxu1 %v3089_v19 }
 0x29f   :  { %2282 = vmatpush1.bf16.msra.mxu0 %v3092_v23  ;;  %2314 = vmatpush1.bf16.msra.mxu1 %v3096_v26 }
 0x2a0   :  { %2284 = vmatprep.subr.bf16.mxu0 %v3100_v29  ;;  %2316 = vmatprep.subr.bf16.mxu1 %v3103_v32 }
 0x2a3   :  { %2286 = vmatpush1.bf16.msra.mxu0 %v3106_v36  ;;  %2318 = vmatpush1.bf16.msra.mxu1 %v3110_v40 }
 0x2a4   :  { %2288 = vmatprep.subr.bf16.mxu0 %v3114_v44  ;;  %2320 = vmatprep.subr.bf16.mxu1 %v3117_v48 }
 0x2a7   :  { %2290 = vmatpush1.bf16.msra.mxu0 %v3120_v54  ;;  %2322 = vmatpush1.bf16.msra.mxu1 %v3124_v58 }
 0x2a8   :  { %2292 = vmatprep.subr.bf16.mxu0 %v3128_v62  ;;  %2324 = vmatprep.subr.bf16.mxu1 %v3131_v4 }
 0x2ab   :  { %2294 = vmatpush1.bf16.msra.mxu0 %v3134_v9  ;;  %2326 = vmatpush1.bf16.msra.mxu1 %v3138_v14 }
 0x2ac   :  { %2296 = vmatprep.subr.bf16.mxu0 %v3142_v18  ;;  %2328 = vmatprep.subr.bf16.mxu1 %v3145_v22 }
 0x2af   :  { %2298 = vmatpush1.bf16.msra.mxu0 %v3148_v25  ;;  %2330 = vmatpush1.bf16.msra.mxu1 %v3152_v27 }
 0x2b0   :  { %2332 = vmatprep.subr.bf16.mxu0 %v3049_v38  ;;  %2364 = vmatprep.subr.bf16.mxu1 %v3051_v41 }
 0x365   :  { %v869_v31 = vpop.f32.mrb[4].mxu0  ;;  %v940_v42 = vpop.f32.mrb[4].mxu1 }
 0x366   :  { %v2615_v43 = vadd.f32 %v869_v31, %v3202_v35  ;;  %v871_v45 = vpop.f32.mrb[5].mxu0  ;;  %v942_v46 = vpop.f32.mrb[5].mxu1  ;;  %v2631_v61 = vadd.f32 %v940_v42, %v3211_v1 }
 0x367   :  { %v2616_v49 = vadd.f32 %v871_v45, %v3204_v37  ;;  %v2632_v55 = vadd.f32 %v942_v46, %v3208_v57 }
 0x368   :  { %v1940_v51 = vmul.f32 -1.442695, %v2615_v43 }
 0x369   :  { %v1941_v52 = vmul.f32 -1.442695, %v2616_v49  ;;  %v1942_v59 = vmul.f32 -1.442695, %v2632_v55 }
 0x36a   :  { %2719 = vpow2.f32 %v1940_v51 }
 0x36b   :  { %2721 = vpow2.f32 %v1941_v52 }
 0x36c   :  { %2723 = vpow2.f32 %v1942_v59 }
 0x36d   :  { %2725 = vtanh.f32 %v2631_v61 }
 0x374   :  { %v2720_v2 = vpop.eup %2719 }
 0x375   :  { %v2722_v5 = vpop.eup %2721  ;;  %v952_v7 = vadd.f32 1.0, %v2720_v2 }
 0x376   :  { %v958_v8 = vadd.f32 1.0, %v2722_v5  ;;  %v2724_v11 = vpop.eup %2723 }
 0x377   :  { %2727 = vrcp.f32 %v952_v7  ;;  %v2726_v12 = vpop.eup %2725  ;;  %v965_v21 = vadd.f32 1.0, %v2724_v11 }
 0x378   :  { %2729 = vrcp.f32 %v958_v8 }
 0x379   :  { %2731 = vrcp.f32 %v965_v21 }
 0x381   :  { %v2728_v15 = vpop.eup %2727 }
 0x382   :  { %v2730_v17 = vpop.eup %2729  ;;  %v969_v20 = vmul.f32 %v2728_v15, %v2726_v12 }
 0x383   :  { %v968_v24 = vmul.f32 %v2730_v17, %v3256_v30  ;;  %v2732_v33 = vpop.eup %2731 }
 0x385   :  { %v3298_v28 = vadd.f32 %v969_v20, %v968_v24 }
 0x387   :  { %2733 = vtanh.f32 %v3298_v28 }
 0x391   :  { %v2734_v34 = vpop.eup %2733 }
 0x392   :  { %v972_v39 = vmul.f32 %v2734_v34, %v2732_v33 }
 0x394   :  { %1038 = vmatmul.mubr.f32.vlgmr.msra.gmra.mrb[6].mxu0 %v972_v39  ;;  %1109 = vmatmul.mubr.f32.vlgmr.msra.gmra.mrb[6].mxu1 %v972_v39 }
 0x395   :  { %2334 = vmatpush1.bf16.msra.mxu0 %v3053_v47  ;;  %2366 = vmatpush1.bf16.msra.mxu1 %v3056_v50 }
 0x396   :  { %2336 = vmatprep.subr.bf16.mxu0 %v3059_v53  ;;  %2368 = vmatprep.subr.bf16.mxu1 %v3061_v56 }
 0x397   :  { %1207 = vmatprep.mubr.f32.mxu0 %v2941_v0  ;;  %1278 = vmatprep.mubr.f32.mxu1 %v2941_v0 }
 0x399   :  { %2338 = vmatpush1.bf16.msra.mxu0 %v3064_v60  ;;  %2370 = vmatpush1.bf16.msra.mxu1 %v3068_v63 }
 0x39a   :  { %2340 = vmatprep.subr.bf16.mxu0 %v3072_v3  ;;  %2372 = vmatprep.subr.bf16.mxu1 %v3075_v6 }
 0x39d   :  { %2342 = vmatpush1.bf16.msra.mxu0 %v3078_v10  ;;  %2374 = vmatpush1.bf16.msra.mxu1 %v3082_v13 }
 0x39e   :  { %2344 = vmatprep.subr.bf16.mxu0 %v3086_v16  ;;  %2376 = vmatprep.subr.bf16.mxu1 %v3089_v19 }
 0x3a1   :  { %2346 = vmatpush1.bf16.msra.mxu0 %v3092_v23  ;;  %2378 = vmatpush1.bf16.msra.mxu1 %v3096_v26 }
 0x3a2   :  { %2348 = vmatprep.subr.bf16.mxu0 %v3100_v29  ;;  %2380 = vmatprep.subr.bf16.mxu1 %v3103_v32 }
 0x3a5   :  { %2350 = vmatpush1.bf16.msra.mxu0 %v3106_v36  ;;  %2382 = vmatpush1.bf16.msra.mxu1 %v3110_v40 }
 0x3a6   :  { %2352 = vmatprep.subr.bf16.mxu0 %v3114_v44  ;;  %2384 = vmatprep.subr.bf16.mxu1 %v3117_v48 }
 0x3a9   :  { %2354 = vmatpush1.bf16.msra.mxu0 %v3120_v54  ;;  %2386 = vmatpush1.bf16.msra.mxu1 %v3124_v58 }
 0x3aa   :  { %2356 = vmatprep.subr.bf16.mxu0 %v3128_v62  ;;  %2388 = vmatprep.subr.bf16.mxu1 %v3131_v4 }
 0x3ad   :  { %2358 = vmatpush1.bf16.msra.mxu0 %v3134_v9  ;;  %2390 = vmatpush1.bf16.msra.mxu1 %v3138_v14 }
 0x3ae   :  { %2360 = vmatprep.subr.bf16.mxu0 %v3142_v18  ;;  %2392 = vmatprep.subr.bf16.mxu1 %v3145_v22 }
 0x3b1   :  { %2362 = vmatpush1.bf16.msra.mxu0 %v3148_v25  ;;  %2394 = vmatpush1.bf16.msra.mxu1 %v3152_v27 }
 0x3b2   :  { %2396 = vmatprep.subr.bf16.mxu0 %v3049_v38  ;;  %2428 = vmatprep.subr.bf16.mxu1 %v3051_v41 }
 0x467   :  { %v1039_v30 = vpop.f32.mrb[6].mxu0  ;;  %v1110_v31 = vpop.f32.mrb[6].mxu1 }
 0x468   :  { %v2617_v42 = vadd.f32 %v1039_v30, %v3202_v35  ;;  %v1041_v43 = vpop.f32.mrb[7].mxu0  ;;  %v1112_v45 = vpop.f32.mrb[7].mxu1  ;;  %v2633_v59 = vadd.f32 %v1110_v31, %v3211_v1 }
 0x469   :  { %v2618_v46 = vadd.f32 %v1041_v43, %v3204_v37  ;;  %v2634_v52 = vadd.f32 %v1112_v45, %v3208_v57 }
 0x46a   :  { %v1943_v49 = vmul.f32 -1.442695, %v2617_v42 }
 0x46b   :  { %v1944_v51 = vmul.f32 -1.442695, %v2618_v46  ;;  %v1945_v55 = vmul.f32 -1.442695, %v2634_v52 }
 0x46c   :  { %2735 = vpow2.f32 %v1943_v49 }
 0x46d   :  { %2737 = vpow2.f32 %v1944_v51 }
 0x46e   :  { %2739 = vpow2.f32 %v1945_v55 }
 0x46f   :  { %2741 = vtanh.f32 %v2633_v59 }
 0x476   :  { %v2736_v61 = vpop.eup %2735 }
 0x477   :  { %v2738_v2 = vpop.eup %2737  ;;  %v1122_v5 = vadd.f32 1.0, %v2736_v61 }
 0x478   :  { %v1128_v7 = vadd.f32 1.0, %v2738_v2  ;;  %v2740_v8 = vpop.eup %2739 }
 0x479   :  { %2743 = vrcp.f32 %v1122_v5  ;;  %v2742_v11 = vpop.eup %2741  ;;  %v1135_v20 = vadd.f32 1.0, %v2740_v8 }
 0x47a   :  { %2745 = vrcp.f32 %v1128_v7 }
 0x47b   :  { %2747 = vrcp.f32 %v1135_v20 }
 0x483   :  { %v2744_v12 = vpop.eup %2743 }
 0x484   :  { %v2746_v15 = vpop.eup %2745  ;;  %v1139_v17 = vmul.f32 %v2744_v12, %v2742_v11 }
 0x485   :  { %v1138_v21 = vmul.f32 %v2746_v15, %v3298_v28  ;;  %v2748_v33 = vpop.eup %2747 }
 0x487   :  { %v3340_v24 = vadd.f32 %v1139_v17, %v1138_v21 }
 0x489   :  { %2749 = vtanh.f32 %v3340_v24 }
 0x493   :  { %v2750_v34 = vpop.eup %2749 }
 0x494   :  { %v1142_v39 = vmul.f32 %v2750_v34, %v2748_v33 }
 0x496   :  { %1208 = vmatmul.mubr.f32.vlgmr.msra.gmra.mrb[8].mxu0 %v1142_v39  ;;  %1279 = vmatmul.mubr.f32.vlgmr.msra.gmra.mrb[8].mxu1 %v1142_v39 }
 0x497   :  { %2398 = vmatpush1.bf16.msra.mxu0 %v3053_v47  ;;  %2430 = vmatpush1.bf16.msra.mxu1 %v3056_v50 }
 0x498   :  { %2400 = vmatprep.subr.bf16.mxu0 %v3059_v53  ;;  %2432 = vmatprep.subr.bf16.mxu1 %v3061_v56 }
 0x499   :  { %1377 = vmatprep.mubr.f32.mxu0 %v2941_v0  ;;  %1448 = vmatprep.mubr.f32.mxu1 %v2941_v0 }
 0x49b   :  { %2402 = vmatpush1.bf16.msra.mxu0 %v3064_v60  ;;  %2434 = vmatpush1.bf16.msra.mxu1 %v3068_v63 }
 0x49c   :  { %2404 = vmatprep.subr.bf16.mxu0 %v3072_v3  ;;  %2436 = vmatprep.subr.bf16.mxu1 %v3075_v6 }
 0x49f   :  { %2406 = vmatpush1.bf16.msra.mxu0 %v3078_v10  ;;  %2438 = vmatpush1.bf16.msra.mxu1 %v3082_v13 }
 0x4a0   :  { %2408 = vmatprep.subr.bf16.mxu0 %v3086_v16  ;;  %2440 = vmatprep.subr.bf16.mxu1 %v3089_v19 }
 0x4a3   :  { %2410 = vmatpush1.bf16.msra.mxu0 %v3092_v23  ;;  %2442 = vmatpush1.bf16.msra.mxu1 %v3096_v26 }
 0x4a4   :  { %2412 = vmatprep.subr.bf16.mxu0 %v3100_v29  ;;  %2444 = vmatprep.subr.bf16.mxu1 %v3103_v32 }
 0x4a7   :  { %2414 = vmatpush1.bf16.msra.mxu0 %v3106_v36  ;;  %2446 = vmatpush1.bf16.msra.mxu1 %v3110_v40 }
 0x4a8   :  { %2416 = vmatprep.subr.bf16.mxu0 %v3114_v44  ;;  %2448 = vmatprep.subr.bf16.mxu1 %v3117_v48 }
 0x4ab   :  { %2418 = vmatpush1.bf16.msra.mxu0 %v3120_v54  ;;  %2450 = vmatpush1.bf16.msra.mxu1 %v3124_v58 }
 0x4ac   :  { %2420 = vmatprep.subr.bf16.mxu0 %v3128_v62  ;;  %2452 = vmatprep.subr.bf16.mxu1 %v3131_v4 }
 0x4af   :  { %2422 = vmatpush1.bf16.msra.mxu0 %v3134_v9  ;;  %2454 = vmatpush1.bf16.msra.mxu1 %v3138_v14 }
 0x4b0   :  { %2424 = vmatprep.subr.bf16.mxu0 %v3142_v18  ;;  %2456 = vmatprep.subr.bf16.mxu1 %v3145_v22 }
 0x4b3   :  { %2426 = vmatpush1.bf16.msra.mxu0 %v3148_v25  ;;  %2458 = vmatpush1.bf16.msra.mxu1 %v3152_v27 }
 0x4b4   :  { %2460 = vmatprep.subr.bf16.mxu0 %v3049_v38  ;;  %2492 = vmatprep.subr.bf16.mxu1 %v3051_v41 }
 0x569   :  { %v1209_v28 = vpop.f32.mrb[8].mxu0  ;;  %v1280_v30 = vpop.f32.mrb[8].mxu1 }
 0x56a   :  { %v2619_v31 = vadd.f32 %v1209_v28, %v3202_v35  ;;  %v1211_v42 = vpop.f32.mrb[9].mxu0  ;;  %v1282_v43 = vpop.f32.mrb[9].mxu1  ;;  %v2635_v55 = vadd.f32 %v1280_v30, %v3211_v1 }
 0x56b   :  { %v2620_v45 = vadd.f32 %v1211_v42, %v3204_v37  ;;  %v2636_v51 = vadd.f32 %v1282_v43, %v3208_v57 }
 0x56c   :  { %v1946_v46 = vmul.f32 -1.442695, %v2619_v31 }
 0x56d   :  { %v1947_v49 = vmul.f32 -1.442695, %v2620_v45  ;;  %v1948_v52 = vmul.f32 -1.442695, %v2636_v51 }
 0x56e   :  { %2751 = vpow2.f32 %v1946_v46 }
 0x56f   :  { %2753 = vpow2.f32 %v1947_v49 }
 0x570   :  { %2755 = vpow2.f32 %v1948_v52 }
 0x571   :  { %2757 = vtanh.f32 %v2635_v55 }
 0x578   :  { %v2752_v59 = vpop.eup %2751 }
 0x579   :  { %v2754_v61 = vpop.eup %2753  ;;  %v1292_v2 = vadd.f32 1.0, %v2752_v59 }
 0x57a   :  { %v1298_v5 = vadd.f32 1.0, %v2754_v61  ;;  %v2756_v7 = vpop.eup %2755 }
 0x57b   :  { %2759 = vrcp.f32 %v1292_v2  ;;  %v2758_v8 = vpop.eup %2757  ;;  %v1305_v17 = vadd.f32 1.0, %v2756_v7 }
 0x57c   :  { %2761 = vrcp.f32 %v1298_v5 }
 0x57d   :  { %2763 = vrcp.f32 %v1305_v17 }
 0x585   :  { %v2760_v11 = vpop.eup %2759 }
 0x586   :  { %v2762_v12 = vpop.eup %2761  ;;  %v1309_v15 = vmul.f32 %v2760_v11, %v2758_v8 }
 0x587   :  { %v1308_v20 = vmul.f32 %v2762_v12, %v3340_v24  ;;  %v2764_v33 = vpop.eup %2763 }
 0x589   :  { %v3382_v21 = vadd.f32 %v1309_v15, %v1308_v20 }
 0x58b   :  { %2765 = vtanh.f32 %v3382_v21 }
 0x595   :  { %v2766_v34 = vpop.eup %2765 }
 0x596   :  { %v1312_v39 = vmul.f32 %v2766_v34, %v2764_v33  ;;  %v1826_v34 = vld [vmem:[#allocation8 + $0x18] sm:$0xff] }
 0x598   :  { %1378 = vmatmul.mubr.f32.vlgmr.msra.gmra.mrb[10].mxu0 %v1312_v39  ;;  %1449 = vmatmul.mubr.f32.vlgmr.msra.gmra.mrb[10].mxu1 %v1312_v39 }
 0x599   :  { %2462 = vmatpush1.bf16.msra.mxu0 %v3053_v47  ;;  %2494 = vmatpush1.bf16.msra.mxu1 %v3056_v50 }
 0x59a   :  { %2464 = vmatprep.subr.bf16.mxu0 %v3059_v53  ;;  %2496 = vmatprep.subr.bf16.mxu1 %v3061_v56 }
 0x59b   :  { %1547 = vmatprep.mubr.f32.mxu0 %v2941_v0  ;;  %1618 = vmatprep.mubr.f32.mxu1 %v2941_v0 }
 0x59d   :  { %2466 = vmatpush1.bf16.msra.mxu0 %v3064_v60  ;;  %2498 = vmatpush1.bf16.msra.mxu1 %v3068_v63 }
 0x59e   :  { %2468 = vmatprep.subr.bf16.mxu0 %v3072_v3  ;;  %2500 = vmatprep.subr.bf16.mxu1 %v3075_v6 }
 0x5a1   :  { %2470 = vmatpush1.bf16.msra.mxu0 %v3078_v10  ;;  %2502 = vmatpush1.bf16.msra.mxu1 %v3082_v13 }
 0x5a2   :  { %2472 = vmatprep.subr.bf16.mxu0 %v3086_v16  ;;  %2504 = vmatprep.subr.bf16.mxu1 %v3089_v19 }
 0x5a5   :  { %2474 = vmatpush1.bf16.msra.mxu0 %v3092_v23  ;;  %2506 = vmatpush1.bf16.msra.mxu1 %v3096_v26 }
 0x5a6   :  { %2476 = vmatprep.subr.bf16.mxu0 %v3100_v29  ;;  %2508 = vmatprep.subr.bf16.mxu1 %v3103_v32 }
 0x5a9   :  { %2478 = vmatpush1.bf16.msra.mxu0 %v3106_v36  ;;  %2510 = vmatpush1.bf16.msra.mxu1 %v3110_v40 }
 0x5aa   :  { %2480 = vmatprep.subr.bf16.mxu0 %v3114_v44  ;;  %2512 = vmatprep.subr.bf16.mxu1 %v3117_v48 }
 0x5ad   :  { %2482 = vmatpush1.bf16.msra.mxu0 %v3120_v54  ;;  %2514 = vmatpush1.bf16.msra.mxu1 %v3124_v58 }
 0x5ae   :  { %2484 = vmatprep.subr.bf16.mxu0 %v3128_v62  ;;  %2516 = vmatprep.subr.bf16.mxu1 %v3131_v4 }
 0x5b1   :  { %2486 = vmatpush1.bf16.msra.mxu0 %v3134_v9  ;;  %2518 = vmatpush1.bf16.msra.mxu1 %v3138_v14 }
 0x5b2   :  { %2488 = vmatprep.subr.bf16.mxu0 %v3142_v18  ;;  %2520 = vmatprep.subr.bf16.mxu1 %v3145_v22 }
 0x5b5   :  { %2490 = vmatpush1.bf16.msra.mxu0 %v3148_v25  ;;  %2522 = vmatpush1.bf16.msra.mxu1 %v3152_v27 }
 0x5b6   :  { %2524 = vmatprep.subr.bf16.mxu0 %v3049_v38  ;;  %2556 = vmatprep.subr.bf16.mxu1 %v3051_v41 }
 0x66b   :  { %v1379_v24 = vpop.f32.mrb[10].mxu0  ;;  %v1450_v28 = vpop.f32.mrb[10].mxu1 }
 0x66c   :  { %v2621_v30 = vadd.f32 %v1379_v24, %v3202_v35  ;;  %v1381_v31 = vpop.f32.mrb[11].mxu0  ;;  %v1452_v42 = vpop.f32.mrb[11].mxu1  ;;  %v2637_v52 = vadd.f32 %v1450_v28, %v3211_v1  ;;  %v1827_v24 = vld [vmem:[#allocation8 + $0x20] sm:$0xff]  ;;  %v1828_v28 = vld [vmem:[#allocation8 + $0x28] sm:$0xff] }
 0x66d   :  { %v2622_v43 = vadd.f32 %v1381_v31, %v3204_v37  ;;  %v2638_v49 = vadd.f32 %v1452_v42, %v3208_v57  ;;  %v1829_v31 = vld [vmem:[#allocation8 + $0x30] sm:$0xff]  ;;  %v1830_v42 = vld [vmem:[#allocation8 + $0x38] sm:$0xff] }
 0x66e   :  { %v1949_v45 = vmul.f32 -1.442695, %v2621_v30  ;;  %v2594_v30 = vpack.c.bf16 %v1828_v28, %v1827_v24 }
 0x66f   :  { %v1950_v46 = vmul.f32 -1.442695, %v2622_v43  ;;  %v1951_v51 = vmul.f32 -1.442695, %v2638_v49  ;;  %v2597_v43 = vpack.c.bf16 %v1830_v42, %v1829_v31 }
 0x670   :  { %2767 = vpow2.f32 %v1949_v45  ;;  %v1831_v45 = vld [vmem:[#allocation8 + $0x40] sm:$0xff] }
 0x671   :  { %2769 = vpow2.f32 %v1950_v46  ;;  %v1832_v46 = vld [vmem:[#allocation8 + $0x48] sm:$0xff] }
 0x672   :  { %2771 = vpow2.f32 %v1951_v51  ;;  %v2600_v49 = vpack.c.bf16 %v1832_v46, %v1831_v45  ;;  %v1833_v51 = vld [vmem:[#allocation8 + $0x50] sm:$0xff] }
 0x673   :  { %2773 = vtanh.f32 %v2637_v52  ;;  %v1834_v52 = vld [vmem:[#allocation8 + $0x58] sm:$0xff] }
 0x67a   :  { %v2768_v38 = vpop.eup %2767 }
 0x67b   :  { %v2770_v55 = vpop.eup %2769  ;;  %v1462_v41 = vadd.f32 1.0, %v2768_v38  ;;  %v1835_v38 = vld [vmem:[#allocation8 + $0x60] sm:$0xff] }
 0x67c   :  { %v1468_v59 = vadd.f32 1.0, %v2770_v55  ;;  %v2772_v61 = vpop.eup %2771  ;;  %v2603_v55 = vpack.c.bf16 %v1834_v52, %v1833_v51 }
 0x67d   :  { %2775 = vrcp.f32 %v1462_v41  ;;  %v2774_v2 = vpop.eup %2773  ;;  %v1475_v11 = vadd.f32 1.0, %v2772_v61  ;;  %v1836_v41 = vld [vmem:[#allocation8 + $0x68] sm:$0xff]  ;;  %v1837_v61 = vld [vmem:[#allocation8 + $0x70] sm:$0xff] }
 0x67e   :  { %2777 = vrcp.f32 %v1468_v59  ;;  %v2606_v59 = vpack.c.bf16 %v1836_v41, %v1835_v38 }
 0x67f   :  { %2779 = vrcp.f32 %v1475_v11 }
 0x687   :  { %v2776_v5 = vpop.eup %2775 }
 0x688   :  { %v2778_v7 = vpop.eup %2777  ;;  %v1479_v8 = vmul.f32 %v2776_v5, %v2774_v2  ;;  %v1838_v2 = vld [vmem:[#allocation8 + $0x78] sm:$0xff] }
 0x689   :  { %v1478_v12 = vmul.f32 %v2778_v7, %v3382_v21  ;;  %v2780_v17 = vpop.eup %2779  ;;  %v1825_v21 = vld [vmem:[#allocation8 + $0x10] sm:$0xff]  ;;  %v2609_v5 = vpack.c.bf16 %v1838_v2, %v1837_v61 }
 0x68a   :  { %v2591_v39 = vpack.c.bf16 %v1826_v34, %v1825_v21 }
 0x68b   :  { %v3424_v15 = vadd.f32 %v1479_v8, %v1478_v12 }
 0x68d   :  { %2781 = vtanh.f32 %v3424_v15 }
 0x697   :  { %v2782_v20 = vpop.eup %2781 }
 0x698   :  { %v1482_v33 = vmul.f32 %v2782_v20, %v2780_v17 }
 0x69a   :  { %1548 = vmatmul.mubr.f32.vlgmr.msra.gmra.mrb[12].mxu0 %v1482_v33  ;;  %1619 = vmatmul.mubr.f32.vlgmr.msra.gmra.mrb[12].mxu1 %v1482_v33 }
 0x69b   :  { %2526 = vmatpush1.bf16.msra.mxu0 %v3053_v47  ;;  %2558 = vmatpush1.bf16.msra.mxu1 %v3056_v50 }
 0x69c   :  { %2528 = vmatprep.subr.bf16.mxu0 %v3059_v53  ;;  %2560 = vmatprep.subr.bf16.mxu1 %v3061_v56 }
 0x69d   :  { %1717 = vmatprep.mubr.f32.mxu0 %v2941_v0  ;;  %1788 = vmatprep.mubr.f32.mxu1 %v2941_v0 }
 0x69f   :  { %2530 = vmatpush1.bf16.msra.mxu0 %v3064_v60  ;;  %2562 = vmatpush1.bf16.msra.mxu1 %v3068_v63 }
 0x6a0   :  { %2532 = vmatprep.subr.bf16.mxu0 %v3072_v3  ;;  %2564 = vmatprep.subr.bf16.mxu1 %v3075_v6 }
 0x6a3   :  { %2534 = vmatpush1.bf16.msra.mxu0 %v3078_v10  ;;  %2566 = vmatpush1.bf16.msra.mxu1 %v3082_v13 }
 0x6a4   :  { %2536 = vmatprep.subr.bf16.mxu0 %v3086_v16  ;;  %2568 = vmatprep.subr.bf16.mxu1 %v3089_v19 }
 0x6a7   :  { %2538 = vmatpush1.bf16.msra.mxu0 %v3092_v23  ;;  %2570 = vmatpush1.bf16.msra.mxu1 %v3096_v26 }
 0x6a8   :  { %2540 = vmatprep.subr.bf16.mxu0 %v3100_v29  ;;  %2572 = vmatprep.subr.bf16.mxu1 %v3103_v32 }
 0x6ab   :  { %2542 = vmatpush1.bf16.msra.mxu0 %v3106_v36  ;;  %2574 = vmatpush1.bf16.msra.mxu1 %v3110_v40 }
 0x6ac   :  { %2544 = vmatprep.subr.bf16.mxu0 %v3114_v44  ;;  %2576 = vmatprep.subr.bf16.mxu1 %v3117_v48 }
 0x6af   :  { %2546 = vmatpush1.bf16.msra.mxu0 %v3120_v54  ;;  %2578 = vmatpush1.bf16.msra.mxu1 %v3124_v58 }
 0x6b0   :  { %2548 = vmatprep.subr.bf16.mxu0 %v3128_v62  ;;  %2580 = vmatprep.subr.bf16.mxu1 %v3131_v4 }
 0x6b3   :  { %2550 = vmatpush1.bf16.msra.mxu0 %v3134_v9  ;;  %2582 = vmatpush1.bf16.msra.mxu1 %v3138_v14 }
 0x6b4   :  { %2552 = vmatprep.subr.bf16.mxu0 %v3142_v18  ;;  %2584 = vmatprep.subr.bf16.mxu1 %v3145_v22  ;;  %v1823_v18 = vld [vmem:[#allocation8] sm:$0xff]  ;;  %v1824_v22 = vld [vmem:[#allocation8 + $0x8] sm:$0xff] }
 0x6b7   :  { %2554 = vmatpush1.bf16.msra.mxu0 %v3148_v25  ;;  %2586 = vmatpush1.bf16.msra.mxu1 %v3152_v27  ;;  %v2588_v25 = vpack.c.bf16 %v1824_v22, %v1823_v18  ;;  %v2942_v27 = vmov 0.0|0.0  }
 0x6b8   :  { %2587 = vmatprep.subr.bf16.mxu0 %v2942_v27 }
 0x76d   :  { %v1549_v47 = vpop.f32.mrb[12].mxu0  ;;  %v1620_v50 = vpop.f32.mrb[12].mxu1 }
 0x76e   :  { %v2623_v53 = vadd.f32 %v1549_v47, %v3202_v35  ;;  %v1551_v56 = vpop.f32.mrb[13].mxu0  ;;  %v1622_v60 = vpop.f32.mrb[13].mxu1  ;;  %v2639_v16 = vadd.f32 %v1620_v50, %v3211_v1 }
 0x76f   :  { %v2624_v63 = vadd.f32 %v1551_v56, %v3204_v37  ;;  %v2640_v10 = vadd.f32 %v1622_v60, %v3208_v57 }
 0x770   :  { %v1952_v3 = vmul.f32 -1.442695, %v2623_v53 }
 0x771   :  { %v1953_v6 = vmul.f32 -1.442695, %v2624_v63  ;;  %v1954_v13 = vmul.f32 -1.442695, %v2640_v10 }
 0x772   :  { %2783 = vpow2.f32 %v1952_v3 }
 0x773   :  { %2785 = vpow2.f32 %v1953_v6 }
 0x774   :  { %2787 = vpow2.f32 %v1954_v13 }
 0x775   :  { %2789 = vtanh.f32 %v2639_v16 }
 0x77c   :  { %v2784_v19 = vpop.eup %2783 }
 0x77d   :  { %v2786_v23 = vpop.eup %2785  ;;  %v1632_v26 = vadd.f32 1.0, %v2784_v19 }
 0x77e   :  { %v1638_v29 = vadd.f32 1.0, %v2786_v23  ;;  %v2788_v32 = vpop.eup %2787 }
 0x77f   :  { %2791 = vrcp.f32 %v1632_v26  ;;  %v2790_v36 = vpop.eup %2789  ;;  %v1645_v54 = vadd.f32 1.0, %v2788_v32  ;;  %v1958_v26 = vld [vmem:[%s3493_s5] ss:$0 sm:$0xff] }
 0x780   :  { %2793 = vrcp.f32 %v1638_v29 }
 0x781   :  { %2795 = vrcp.f32 %v1645_v54 }
 0x789   :  { %v2792_v40 = vpop.eup %2791 }
 0x78a   :  { %v2794_v44 = vpop.eup %2793  ;;  %v1649_v48 = vmul.f32 %v2792_v40, %v2790_v36 }
 0x78b   :  { %v1648_v58 = vmul.f32 %v2794_v44, %v3424_v15  ;;  %v2796_v4 = vpop.eup %2795 }
 0x78d   :  { %v3464_v62 = vadd.f32 %v1649_v48, %v1648_v58 }
 0x78f   :  { %2797 = vtanh.f32 %v3464_v62 }
 0x799   :  { %v2798_v9 = vpop.eup %2797 }
 0x79a   :  { %v1652_v14 = vmul.f32 %v2798_v9, %v2796_v4 }
 0x79c   :  { %1718 = vmatmul.mubr.f32.vlgmr.msra.gmra.mrb[14].mxu0 %v1652_v14  ;;  %1789 = vmatmul.mubr.f32.vlgmr.msra.gmra.mrb[14].mxu1 %v1652_v14 }
 0x79d   :  { %2589 = vmatpush3.bf16.msra.mxu0 %v2588_v25  ;;  %2008 = vmatprep.mubr.msk.f32.mxu0 %vm2943_vm0, %v2941_v0 }
 0x79e   :  { %2590 = vmatprep.subr.bf16.mxu0 %v2942_v27 }
 0x7a1   :  { %2592 = vmatpush3.bf16.msra.mxu0 %v2591_v39 }
 0x7a2   :  { %2593 = vmatprep.subr.bf16.mxu0 %v2942_v27 }
 0x7a5   :  { %2595 = vmatpush3.bf16.msra.mxu0 %v2594_v30 }
 0x7a6   :  { %2596 = vmatprep.subr.bf16.mxu0 %v2942_v27 }
 0x7a9   :  { %2598 = vmatpush3.bf16.msra.mxu0 %v2597_v43 }
 0x7aa   :  { %2599 = vmatprep.subr.bf16.mxu0 %v2942_v27 }
 0x7ad   :  { %2601 = vmatpush3.bf16.msra.mxu0 %v2600_v49 }
 0x7ae   :  { %2602 = vmatprep.subr.bf16.mxu0 %v2942_v27 }
 0x7b1   :  { %2604 = vmatpush3.bf16.msra.mxu0 %v2603_v55 }
 0x7b2   :  { %2605 = vmatprep.subr.bf16.mxu0 %v2942_v27 }
 0x7b5   :  { %2607 = vmatpush3.bf16.msra.mxu0 %v2606_v59 }
 0x7b6   :  { %2608 = vmatprep.subr.bf16.mxu0 %v2942_v27 }
 0x7b9   :  { %2610 = vmatpush3.bf16.msra.mxu0 %v2609_v5 }
 0x86f   :  { %v1719_v7 = vpop.f32.mrb[14].mxu0  ;;  %v1790_v8 = vpop.f32.mrb[14].mxu1 }
 0x870   :  { %v2625_v11 = vadd.f32 %v1719_v7, %v3202_v35  ;;  %v1721_v12 = vpop.f32.mrb[15].mxu0  ;;  %v1792_v15 = vpop.f32.mrb[15].mxu1  ;;  %v2641_v50 = vadd.f32 %v1790_v8, %v3211_v1 }
 0x871   :  { %v2626_v17 = vadd.f32 %v1721_v12, %v3204_v37  ;;  %v2642_v0 = vadd.f32 %v1792_v15, %v3208_v57 }
 0x872   :  { %v1955_v20 = vmul.f32 -1.442695, %v2625_v11 }
 0x873   :  { %v1956_v33 = vmul.f32 -1.442695, %v2626_v17  ;;  %v1957_v47 = vmul.f32 -1.442695, %v2642_v0 }
 0x874   :  { %2799 = vpow2.f32 %v1955_v20 }
 0x875   :  { %2801 = vpow2.f32 %v1956_v33 }
 0x876   :  { %2803 = vpow2.f32 %v1957_v47 }
 0x877   :  { %2805 = vtanh.f32 %v2641_v50 }
 0x87e   :  { %v2800_v53 = vpop.eup %2799 }
 0x87f   :  { %v2802_v56 = vpop.eup %2801  ;;  %v1802_v60 = vadd.f32 1.0, %v2800_v53 }
 0x880   :  { %v1808_v63 = vadd.f32 1.0, %v2802_v56  ;;  %v2804_v35 = vpop.eup %2803 }
 0x881   :  { %2807 = vrcp.f32 %v1802_v60  ;;  %v2806_v3 = vpop.eup %2805  ;;  %v1815_v13 = vadd.f32 1.0, %v2804_v35 }
 0x882   :  { %2809 = vrcp.f32 %v1808_v63 }
 0x883   :  { %2811 = vrcp.f32 %v1815_v13 }
 0x88b   :  { %v2808_v37 = vpop.eup %2807 }
 0x88c   :  { %v2810_v6 = vpop.eup %2809  ;;  %v1819_v10 = vmul.f32 %v2808_v37, %v2806_v3 }
 0x88d   :  { %v1818_v16 = vmul.f32 %v2810_v6, %v3464_v62  ;;  %v2812_v1 = vpop.eup %2811 }
 0x88f   :  { %v1820_v57 = vadd.f32 %v1819_v10, %v1818_v16 }
 0x891   :  { %2813 = vtanh.f32 %v1820_v57 }
 0x89b   :  { %v2814_v19 = vpop.eup %2813 }
 0x89c   :  { %v1822_v23 = vmul.f32 %v2814_v19, %v2812_v1 }
 0x89e   :  { %2009 = vmatmul.mubr.f32.vlgmr.msra.gmra.mrb[16].mxu0 %v1822_v23 }
 0x971   :  { %v1912_v29 = vpop.f32.mrb[16].mxu0 }
 0x972   :  { %v1913_v32 = vadd.f32 %v1958_v26, %v1912_v29  ;;  %v2010_v36 = vpop.f32.mrb[17].mxu0 }
 0x974   :  { %1916 = vst [vmem:[#allocation10] sm:$0xff] %v1913_v32 }
 0x975   :  { %2914 = shalt.err (!%p2911_p8)
}
 0x976   :  { %s2915_s28 = scalar_lea.hbm %s3494_s6, 128 }
 0x977   :  { %p2916_p9 = scmp.ne.s32.totalorder %s3494_s6, %s2915_s28  ;;  %p2919_p10 = scmp.lt.u32.totalorder %s2915_s28, %s3494_s6 }
 0x979   :  { %p2921_p11 = pnand %p2919_p10, %p2916_p9 }
 0x97b   :  { %2924 = shalt.err (!%p2921_p11)
}
 0x97c   :  { %1926 = dma.vmem_to_hbm [thread:$0]  %s1924_s24, 128, %s3494_s6, [#allocation4]  }
 0x97d   :  { %2931 = dma.done.wait [#allocation4], 128  }
 0x97e   :  { %2932 = vsyncadd [#allocation4], 4294967168 }
 0x97f   :  { %1930 = vsyncpa [#allocation3], 1 }
 0x980   :  { %1931 = vsyncpa [#allocation6], 1 }
 0x981   :  { %1932 = vsyncpa [#allocation9], 1 }
 0x982   :  { %1933 = vsyncpa [#allocation4], 1 }

</bundles_post_ra>
